<compile_context>
chip_gen: v7x
topology: tpu7x:2x2x1
jax: 0.10.0
libtpu: 0.0.40
codegen_flags: <defaults>
</compile_context>

<pallas_src>
import jax
import jax.numpy as jnp
from jax.experimental import pallas as pl
from jax.experimental.pallas import tpu as pltpu

_LANE = 128
_SUBLANE = 8
_NEG_MASK = -1e30          # softmax mask for lane-padded fmem columns


# --------------------------------- helpers -----------------------------------

def _round_up(n, m):
    return (n + m - 1) // m * m


def _pad2d(a, rows, cols, fill=0.0):
    pr, pc = rows - a.shape[0], cols - a.shape[1]
    if pr == 0 and pc == 0:
        return a
    return jnp.pad(a, ((0, pr), (0, pc)), constant_values=fill)


def _derive_vmem_limit():
    """Generation-aware scoped-VMEM limit with headroom for Mosaic scratch."""
    try:
        cap = int(pltpu.get_tpu_info().vmem_capacity_bytes)
    except Exception:
        cap = 64 * 1024 * 1024          # safe on every generation (v7x = 64 MiB)
    lim = (int(cap * 0.85) // (1 << 20)) * (1 << 20)
    return max(32 * 1024 * 1024, lim)


# --------------------------------- kernels ------------------------------------

def _make_kernel(memory, fused):
    """Build the fused forward kernel for the given configuration."""

    def kernel(*refs):
        i = 0
        x_ref = refs[i]; i += 1
        if memory:
            temp_ref, wm1_ref, bm1_ref, wm2_ref, bm2_ref = refs[i:i + 5]; i += 5
        w1_ref, b1_ref = refs[i:i + 2]; i += 2
        if fused:
            wstk_ref, bout_ref, o_ref = refs[i:i + 3]
        else:
            ws_ref, w2_ref, bout_ref, o_ref = refs[i:i + 4]

        x = x_ref[...]                       # keep operand dtype (bf16 ok on MXU)

        if memory:
            temp = temp_ref[0]               # scalar from SMEM (sreg path)
            # mem = softmax((x @ Wm1 + bm1) * temp, axis=-1); padded logit
            # columns carry a -1e30 bias so they vanish under the softmax.
            logits = jnp.dot(x, wm1_ref[...], preferred_element_type=jnp.float32)
            logits = (logits + bm1_ref[...]) * temp
            logits = logits - jnp.max(logits, axis=-1, keepdims=True)
            p = jnp.exp(logits)
            p = p * pl.reciprocal(jnp.sum(p, axis=-1, keepdims=True), approx=True)
            mem = jnp.dot(p.astype(wm2_ref.dtype), wm2_ref[...],
                          preferred_element_type=jnp.float32)
            mem = mem + bm2_ref[...]
            new_x = (x.astype(jnp.float32) + mem).astype(x_ref.dtype)
        else:
            new_x = x

        # block: Linear -> SiLU -> Linear   (SiLU in f32; sigmoid on the EUP)
        h = jnp.dot(new_x, w1_ref[...], preferred_element_type=jnp.float32)
        h = h + b1_ref[...]
        h = h * jax.nn.sigmoid(h)

        if fused:
            # single K=(fin_p + fhidden_p) MXU pass over the pre-stacked [ws; w2]
            w_out = wstk_ref[...]
            xh = jnp.concatenate(
                [new_x.astype(w_out.dtype), h.astype(w_out.dtype)], axis=-1)
            out = jnp.dot(xh, w_out, preferred_element_type=jnp.float32)
        else:
            out = jnp.dot(new_x, ws_ref[...], preferred_element_type=jnp.float32)
            out = out + jnp.dot(h.astype(w2_ref.dtype), w2_ref[...],
                                preferred_element_type=jnp.float32)
        out = out + bout_ref[...]            # folded (bs + b2), f32
        o_ref[...] = out.astype(o_ref.dtype)

    return kernel


# --------------------------------- wrapper ------------------------------------

def linear_residual_block_s(x, params, *, memory=False, temp=None, block_b=None):
    """Forward pass of LinearResidualBlockS via one Pallas kernel.

    params (all pre-transposed to [in, out], biases as [1, out]):
      memory=True : (wm1, bm1, wm2, bm2, ws, bs, w1, b1, w2, b2)
      memory=False: (ws, bs, w1, b1, w2, b2)
    """
    B, fin = x.shape
    if memory:
        wm1, bm1, wm2, bm2, ws, bs, w1, b1, w2, b2 = params
        fmem = wm1.shape[-1]
    else:
        ws, bs, w1, b1, w2, b2 = params
        fmem = 0
    fhidden = w1.shape[-1]
    fout = w2.shape[-1]

    f32 = jnp.float32
    fhidden_p = _round_up(fhidden, _LANE)
    fout_p = _round_up(fout, _LANE)
    fmem_p = _round_up(max(fmem, 1), _LANE) if memory else 0
    fin_p = _round_up(fin, _LANE)

    # Fuse the shortcut and second block matmul into one MXU pass when both K
    # dims badly underfill the MXU.  Requires lane-padding fin (cheap, since the
    # fusion only triggers when fin is small).
    fused = (fin_p + fhidden_p) <= 512
    fin_eff = fin_p if fused else fin

    # ---- resident (constant index_map) weights / biases, lane-dense padded ----
    w1_p = _pad2d(w1, fin_eff, fhidden_p)
    b1_p = _pad2d(b1.reshape(1, -1).astype(f32), 1, fhidden_p)       # SiLU(0)=0
    b_out = bs.reshape(1, -1).astype(f32) + b2.reshape(1, -1).astype(f32)
    bout_p = _pad2d(b_out, 1, fout_p)
    ws_p = _pad2d(ws, fin_eff, fout_p)
    w2_p = _pad2d(w2, fhidden_p, fout_p)

    const_args = []
    if memory:
        wm1_p = _pad2d(wm1, fin_eff, fmem_p)
        bm1_p = _pad2d(bm1.reshape(1, -1).astype(f32), 1, fmem_p, fill=_NEG_MASK)
        wm2_p = _pad2d(wm2, fmem_p, fin_eff)
        bm2_p = _pad2d(bm2.reshape(1, -1).astype(f32), 1, fin_eff)
        const_args += [wm1_p, bm1_p, wm2_p, bm2_p]
    const_args += [w1_p, b1_p]
    if fused:
        const_args += [jnp.concatenate([ws_p, w2_p], axis=0), bout_p]
    else:
        const_args += [ws_p, w2_p, bout_p]

    weight_bytes = int(sum(a.size * a.dtype.itemsize for a in const_args))
    itemsize = x.dtype.itemsize
    vmem_limit = _derive_vmem_limit()

    # ---- batch tiling ----------------------------------------------------------
    B8 = _round_up(B, _SUBLANE)
    if block_b is None:
        row_bytes = 2 * (fin_eff + fout_p) * itemsize       # pipelined x/out tiles
        row_bytes += 4 * (fhidden_p + fout_p)               # f32 h / out
        if memory:
            row_bytes += 4 * (fmem_p + fin_eff)             # f32 probs / new_x
        if fused:
            row_bytes += itemsize * (fin_eff + fhidden_p)   # concat buffer
        row_bytes = int(row_bytes * 1.5)                    # vreg / copy headroom
        budget = vmem_limit - weight_bytes - (4 << 20)
        bb = max(_SUBLANE, min(1024, budget // max(row_bytes, 1)))
        bb = (bb // _SUBLANE) * _SUBLANE
        bb = min(bb, B8)
        # Ensure >=2 grid steps so ("parallel",) can shard across v7x's 2 TCs.
        if bb >= B8 and B8 >= 2 * _SUBLANE:
            bb = _round_up(pl.cdiv(B8, 2), _SUBLANE)
        block_b = int(bb)
    else:
        block_b = int(min(_round_up(max(block_b, 1), _SUBLANE), B8))

    B_pad = _round_up(B, block_b)            # keep every output store unmasked
    grid = (B_pad // block_b,)

    x_p = x
    if B_pad != B or fin_eff != fin:
        x_p = jnp.pad(x, ((0, B_pad - B), (0, fin_eff - fin)))

    x_spec = pl.BlockSpec((block_b, fin_eff), lambda i: (i, 0))
    out_spec = pl.BlockSpec((block_b, fout_p), lambda i: (i, 0))

    args = [x_p]
    if memory:
        if temp is None:
            raise ValueError("memory=True requires temp")
        args.append(jnp.asarray(temp, dtype=f32).reshape(1))   # SMEM scalar
    args += const_args

    kernel = _make_kernel(memory, fused)

    # Advisory cost estimate for the XLA scheduler.
    flops = 2 * B_pad * (fin_eff * fout_p + fin_eff * fhidden_p
                         + fhidden_p * fout_p)
    trans = B_pad * fhidden_p
    if memory:
        flops += 4 * B_pad * fin_eff * fmem_p
        trans += B_pad * fmem_p
    bytes_accessed = int(weight_bytes + B_pad * (fin_eff + fout_p) * itemsize)

    def _run(single_buffer):
        def _const_spec(a):
            if single_buffer:
                return pl.BlockSpec(a.shape, lambda i: (0, 0),
                                    pipeline_mode=pl.Buffered(1))
            return pl.BlockSpec(a.shape, lambda i: (0, 0))

        in_specs = [x_spec]
        if memory:
            in_specs.append(pl.BlockSpec(memory_space=pltpu.MemorySpace.SMEM))
        in_specs += [_const_spec(a) for a in const_args]

        return pl.pallas_call(
            kernel,
            out_shape=jax.ShapeDtypeStruct((B_pad, fout_p), x.dtype),
            grid=grid,
            in_specs=in_specs,
            out_specs=out_spec,
            compiler_params=pltpu.CompilerParams(
                dimension_semantics=("parallel",),
                vmem_limit_bytes=int(vmem_limit)),
            cost_estimate=pl.CostEstimate(flops=int(flops),
                                          transcendentals=int(trans),
                                          bytes_accessed=bytes_accessed),
        )(*args)

    try:
        out = _run(single_buffer=True)
    except Exception:
        # pl.Buffered(1) (single-buffered resident weights) unsupported on this
        # jax build -> fall back to default double-buffering.
        out = _run(single_buffer=False)

    return out[:B, :fout]


# --------------------------- parameter construction ---------------------------

def make_params(key, fin, fout, fhidden=None, memory=False, mem_factor=1,
                dtype=jnp.float32):
    fhidden = max(fin + fout, 1) if fhidden is None else fhidden
    fmem = int(fin * mem_factor)

    def linear(k, n_in, n_out):
        k1, k2 = jax.random.split(k)
        bound = 1.0 / (n_in ** 0.5)
        # stored as [in, out]  (PyTorch stores [out, in]; we pre-transpose)
        w = jax.random.uniform(k1, (n_in, n_out), dtype, -bound, bound)
        b = jax.random.uniform(k2, (1, n_out), dtype, -bound, bound)
        return w, b

    keys = jax.random.split(key, 5)
    ws, bs = linear(keys[0], fin, fout)        # shortcut
    w1, b1 = linear(keys[1], fin, fhidden)     # block[0]
    w2, b2 = linear(keys[2], fhidden, fout)    # block[2]
    if memory:
        wm1, bm1 = linear(keys[3], fin, fmem)  # x_to_mem
        wm2, bm2 = linear(keys[4], fmem, fin)  # mem_to_x
        temp = fmem ** (-0.5)
        return (wm1, bm1, wm2, bm2, ws, bs, w1, b1, w2, b2), temp
    return (ws, bs, w1, b1, w2, b2), None


# ------------------------------ pure-JAX reference ----------------------------

def reference_forward(x, params, *, memory=False, temp=None):
    if memory:
        wm1, bm1, wm2, bm2, ws, bs, w1, b1, w2, b2 = params
        mem = (x @ wm1 + bm1) * temp
        mem = jax.nn.softmax(mem, axis=1)
        mem = mem @ wm2 + bm2
        new_x = x + mem
    else:
        ws, bs, w1, b1, w2, b2 = params
        new_x = x
    h = new_x @ w1 + b1
    h = h * jax.nn.sigmoid(h)
    return (new_x @ ws + bs) + (h @ w2 + b2)


# ------------------------------------ main ------------------------------------

if __name__ == "__main__":
    key = jax.random.PRNGKey(0)
    kx, kp = jax.random.split(key)

    B, fin, fout = 16, 32, 32           # fhidden defaults to fin + fout = 64
    x = jax.random.normal(kx, (B, fin), jnp.float32)

    # memory=True exercises x_to_mem / softmax / mem_to_x (auto block_b path).
    params, temp = make_params(kp, fin, fout, memory=True, mem_factor=1)
    out = jax.block_until_ready(
        linear_residual_block_s(x, params, memory=True, temp=temp))
    ref = reference_forward(x, params, memory=True, temp=temp)
    assert out.shape == (B, fout)
    # approx reciprocal in the softmax denominator -> slightly looser tolerance
    assert jnp.allclose(out, ref, atol=3e-3, rtol=3e-3), "mismatch (memory=True)"

    # memory=False, explicit batch tile (exercises the multi-step grid path).
    params2, _ = make_params(kp, fin, fout, memory=False)
    out2 = jax.block_until_ready(
        linear_residual_block_s(x, params2, memory=False, block_b=8))
    ref2 = reference_forward(x, params2, memory=False)
    assert jnp.allclose(out2, ref2, atol=1e-4, rtol=1e-4), "mismatch (memory=False)"

    # bf16: operands stay bf16 on the MXU, accumulation in f32.  Loose-tolerance
    # accuracy check against the f32 reference on the bf16-rounded params.
    xb = x.astype(jnp.bfloat16)
    params_b = tuple(p.astype(jnp.bfloat16) for p in params)
    out3 = jax.block_until_ready(
        linear_residual_block_s(xb, params_b, memory=True, temp=temp))
    ref3 = reference_forward(xb.astype(jnp.float32),
                             tuple(p.astype(jnp.float32) for p in params_b),
                             memory=True, temp=temp)
    assert out3.shape == (B, fout)
    assert bool(jnp.all(jnp.isfinite(out3.astype(jnp.float32))))
    assert jnp.allclose(out3.astype(jnp.float32), ref3, atol=2e-1, rtol=5e-2), \
        "mismatch (bf16)"

    print("KERNEL_OK")
</pallas_src>

<mosaic_0001>
module attributes {stable_mosaic.version = 11 : i64} {
  func.func @kernel(%arg0: i32, %arg1: memref<8x128xf32, #tpu.memory_space<vmem>>, %arg2: memref<1xf32, #tpu.memory_space<smem>>, %arg3: memref<128x128xf32, #tpu.memory_space<vmem>>, %arg4: memref<1x128xf32, #tpu.memory_space<vmem>>, %arg5: memref<128x128xf32, #tpu.memory_space<vmem>>, %arg6: memref<1x128xf32, #tpu.memory_space<vmem>>, %arg7: memref<128x128xf32, #tpu.memory_space<vmem>>, %arg8: memref<1x128xf32, #tpu.memory_space<vmem>>, %arg9: memref<256x128xf32, #tpu.memory_space<vmem>>, %arg10: memref<1x128xf32, #tpu.memory_space<vmem>>, %arg11: memref<8x128xf32, #tpu.memory_space<vmem>>) attributes {dimension_semantics = [#tpu.dimension_semantics<parallel>], iteration_bounds = array<i64: 2>, scalar_prefetch = 0 : i64, scratch_operands = 0 : i64, tpu.core_type = #tpu.core_type<tc>, window_params = [{transform_indices = @transform_0, window_bounds = array<i64: 8, 128>}, {transform_indices = @transform_1, window_bounds = array<i64: 1>}, {pipeline_mode = #tpu.pipeline_mode<synchronous>, transform_indices = @transform_2, window_bounds = array<i64: 128, 128>}, {pipeline_mode = #tpu.pipeline_mode<synchronous>, transform_indices = @transform_3, window_bounds = array<i64: 1, 128>}, {pipeline_mode = #tpu.pipeline_mode<synchronous>, transform_indices = @transform_4, window_bounds = array<i64: 128, 128>}, {pipeline_mode = #tpu.pipeline_mode<synchronous>, transform_indices = @transform_5, window_bounds = array<i64: 1, 128>}, {pipeline_mode = #tpu.pipeline_mode<synchronous>, transform_indices = @transform_6, window_bounds = array<i64: 128, 128>}, {pipeline_mode = #tpu.pipeline_mode<synchronous>, transform_indices = @transform_7, window_bounds = array<i64: 1, 128>}, {pipeline_mode = #tpu.pipeline_mode<synchronous>, transform_indices = @transform_8, window_bounds = array<i64: 256, 128>}, {pipeline_mode = #tpu.pipeline_mode<synchronous>, transform_indices = @transform_9, window_bounds = array<i64: 1, 128>}, {transform_indices = @transform_10, window_bounds = array<i64: 8, 128>}]} {
    %c0 = arith.constant 0 : index
    %c0_0 = arith.constant 0 : index
    %0 = vector.load %arg1[%c0, %c0_0] : memref<8x128xf32, #tpu.memory_space<vmem>>, vector<8x128xf32>
    %c0_1 = arith.constant 0 : index
    %1 = memref.load %arg2[%c0_1] : memref<1xf32, #tpu.memory_space<smem>>
    %c0_2 = arith.constant 0 : index
    %c0_3 = arith.constant 0 : index
    %2 = vector.load %arg3[%c0_2, %c0_3] : memref<128x128xf32, #tpu.memory_space<vmem>>, vector<128x128xf32>
    %cst = arith.constant dense<0.000000e+00> : vector<8x128xf32>
    %3 = tpu.matmul %0, %2, %cst {dimension_numbers = #tpu.dot_dimension_numbers<[1], [0], [0], [1], [0, 0, 1, 1], [], []>} : vector<8x128xf32>, vector<128x128xf32>, vector<8x128xf32> -> vector<8x128xf32>
    %c0_4 = arith.constant 0 : index
    %c0_5 = arith.constant 0 : index
    %4 = vector.load %arg4[%c0_4, %c0_5] : memref<1x128xf32, #tpu.memory_space<vmem>>, vector<1x128xf32>
    %5 = vector.broadcast %4 : vector<1x128xf32> to vector<8x128xf32>
    %6 = arith.addf %3, %5 : vector<8x128xf32>
    %7 = vector.broadcast %1 : f32 to vector<8x128xf32>
    %8 = arith.mulf %6, %7 : vector<8x128xf32>
    %cst_6 = arith.constant dense<0xFF800000> : vector<8xf32>
    %9 = vector.multi_reduction <maximumf>, %8, %cst_6 [1] : vector<8x128xf32> to vector<8xf32>
    %10 = vector.shape_cast %9 : vector<8xf32> to vector<8x1xf32>
    %11 = vector.broadcast %10 : vector<8x1xf32> to vector<8x128xf32>
    %12 = arith.subf %8, %11 : vector<8x128xf32>
    %13 = math.exp %12 : vector<8x128xf32>
    %cst_7 = arith.constant dense<0.000000e+00> : vector<8xf32>
    %14 = vector.multi_reduction <add>, %13, %cst_7 [1] : vector<8x128xf32> to vector<8xf32>
    %15 = vector.shape_cast %14 : vector<8xf32> to vector<8x1xf32>
    %16 = tpu.reciprocal %15 {approx = true} : vector<8x1xf32> -> vector<8x1xf32>
    %17 = vector.broadcast %16 : vector<8x1xf32> to vector<8x128xf32>
    %18 = arith.mulf %13, %17 : vector<8x128xf32>
    %c0_8 = arith.constant 0 : index
    %c0_9 = arith.constant 0 : index
    %19 = vector.load %arg5[%c0_8, %c0_9] : memref<128x128xf32, #tpu.memory_space<vmem>>, vector<128x128xf32>
    %cst_10 = arith.constant dense<0.000000e+00> : vector<8x128xf32>
    %20 = tpu.matmul %18, %19, %cst_10 {dimension_numbers = #tpu.dot_dimension_numbers<[1], [0], [0], [1], [0, 0, 1, 1], [], []>} : vector<8x128xf32>, vector<128x128xf32>, vector<8x128xf32> -> vector<8x128xf32>
    %c0_11 = arith.constant 0 : index
    %c0_12 = arith.constant 0 : index
    %21 = vector.load %arg6[%c0_11, %c0_12] : memref<1x128xf32, #tpu.memory_space<vmem>>, vector<1x128xf32>
    %22 = vector.broadcast %21 : vector<1x128xf32> to vector<8x128xf32>
    %23 = arith.addf %20, %22 : vector<8x128xf32>
    %24 = arith.addf %0, %23 : vector<8x128xf32>
    %c0_13 = arith.constant 0 : index
    %c0_14 = arith.constant 0 : index
    %25 = vector.load %arg7[%c0_13, %c0_14] : memref<128x128xf32, #tpu.memory_space<vmem>>, vector<128x128xf32>
    %cst_15 = arith.constant dense<0.000000e+00> : vector<8x128xf32>
    %26 = tpu.matmul %24, %25, %cst_15 {dimension_numbers = #tpu.dot_dimension_numbers<[1], [0], [0], [1], [0, 0, 1, 1], [], []>} : vector<8x128xf32>, vector<128x128xf32>, vector<8x128xf32> -> vector<8x128xf32>
    %c0_16 = arith.constant 0 : index
    %c0_17 = arith.constant 0 : index
    %27 = vector.load %arg8[%c0_16, %c0_17] : memref<1x128xf32, #tpu.memory_space<vmem>>, vector<1x128xf32>
    %28 = vector.broadcast %27 : vector<1x128xf32> to vector<8x128xf32>
    %29 = arith.addf %26, %28 : vector<8x128xf32>
    %30 = arith.negf %29 : vector<8x128xf32>
    %31 = math.exp %30 : vector<8x128xf32>
    %cst_18 = arith.constant 1.000000e+00 : f32
    %32 = vector.broadcast %cst_18 : f32 to vector<8x128xf32>
    %33 = arith.addf %32, %31 : vector<8x128xf32>
    %34 = arith.divf %32, %33 : vector<8x128xf32>
    %35 = arith.mulf %29, %34 : vector<8x128xf32>
    %c0_19 = arith.constant 0 : index
    %c0_20 = arith.constant 0 : index
    %36 = vector.load %arg9[%c0_19, %c0_20] : memref<256x128xf32, #tpu.memory_space<vmem>>, vector<256x128xf32>
    %37 = tpu.concatenate %24, %35 in 1 : vector<8x128xf32>, vector<8x128xf32> -> vector<8x256xf32>
    %cst_21 = arith.constant dense<0.000000e+00> : vector<8x128xf32>
    %38 = tpu.matmul %37, %36, %cst_21 {dimension_numbers = #tpu.dot_dimension_numbers<[1], [0], [0], [1], [0, 0, 1, 1], [], []>} : vector<8x256xf32>, vector<256x128xf32>, vector<8x128xf32> -> vector<8x128xf32>
    %c0_22 = arith.constant 0 : index
    %c0_23 = arith.constant 0 : index
    %39 = vector.load %arg10[%c0_22, %c0_23] : memref<1x128xf32, #tpu.memory_space<vmem>>, vector<1x128xf32>
    %40 = vector.broadcast %39 : vector<1x128xf32> to vector<8x128xf32>
    %41 = arith.addf %38, %40 : vector<8x128xf32>
    %c0_24 = arith.constant 0 : index
    %c0_25 = arith.constant 0 : index
    %42 = vector.load %arg11[%c0_24, %c0_25] : memref<8x128xf32, #tpu.memory_space<vmem>>, vector<8x128xf32>
    tpu.vector_store %arg11[%c0_24, %c0_25], %41 {strides = array<i32>} : memref<8x128xf32, #tpu.memory_space<vmem>>, vector<8x128xf32>,
    return
  }
  func.func @transform_0(%arg0: i32) -> (i32, i32) {
    %c0_i32 = arith.constant 0 : i32
    %c0_i32_0 = arith.constant 0 : i32
    return %arg0, %c0_i32 : i32, i32
  }
  func.func @transform_1(%arg0: i32) -> i32 {
    %c0_i32 = arith.constant 0 : i32
    %c0_i32_0 = arith.constant 0 : i32
    return %c0_i32 : i32
  }
  func.func @transform_2(%arg0: i32) -> (i32, i32) {
    %c0_i32 = arith.constant 0 : i32
    %c0_i32_0 = arith.constant 0 : i32
    %c0_i32_1 = arith.constant 0 : i32
    return %c0_i32, %c0_i32_0 : i32, i32
  }
  func.func @transform_3(%arg0: i32) -> (i32, i32) {
    %c0_i32 = arith.constant 0 : i32
    %c0_i32_0 = arith.constant 0 : i32
    %c0_i32_1 = arith.constant 0 : i32
    return %c0_i32, %c0_i32_0 : i32, i32
  }
  func.func @transform_4(%arg0: i32) -> (i32, i32) {
    %c0_i32 = arith.constant 0 : i32
    %c0_i32_0 = arith.constant 0 : i32
    %c0_i32_1 = arith.constant 0 : i32
    return %c0_i32, %c0_i32_0 : i32, i32
  }
  func.func @transform_5(%arg0: i32) -> (i32, i32) {
    %c0_i32 = arith.constant 0 : i32
    %c0_i32_0 = arith.constant 0 : i32
    %c0_i32_1 = arith.constant 0 : i32
    return %c0_i32, %c0_i32_0 : i32, i32
  }
  func.func @transform_6(%arg0: i32) -> (i32, i32) {
    %c0_i32 = arith.constant 0 : i32
    %c0_i32_0 = arith.constant 0 : i32
    %c0_i32_1 = arith.constant 0 : i32
    return %c0_i32, %c0_i32_0 : i32, i32
  }
  func.func @transform_7(%arg0: i32) -> (i32, i32) {
    %c0_i32 = arith.constant 0 : i32
    %c0_i32_0 = arith.constant 0 : i32
    %c0_i32_1 = arith.constant 0 : i32
    return %c0_i32, %c0_i32_0 : i32, i32
  }
  func.func @transform_8(%arg0: i32) -> (i32, i32) {
    %c0_i32 = arith.constant 0 : i32
    %c0_i32_0 = arith.constant 0 : i32
    %c0_i32_1 = arith.constant 0 : i32
    return %c0_i32, %c0_i32_0 : i32, i32
  }
  func.func @transform_9(%arg0: i32) -> (i32, i32) {
    %c0_i32 = arith.constant 0 : i32
    %c0_i32_0 = arith.constant 0 : i32
    %c0_i32_1 = arith.constant 0 : i32
    return %c0_i32, %c0_i32_0 : i32, i32
  }
  func.func @transform_10(%arg0: i32) -> (i32, i32) {
    %c0_i32 = arith.constant 0 : i32
    %c0_i32_0 = arith.constant 0 : i32
    return %arg0, %c0_i32 : i32, i32
  }
}

module attributes {stable_mosaic.version = 11 : i64} {
  func.func @kernel(%arg0: i32, %arg1: memref<8x128xf32, #tpu.memory_space<vmem>>, %arg2: memref<1xf32, #tpu.memory_space<smem>>, %arg3: memref<128x128xf32, #tpu.memory_space<vmem>>, %arg4: memref<1x128xf32, #tpu.memory_space<vmem>>, %arg5: memref<128x128xf32, #tpu.memory_space<vmem>>, %arg6: memref<1x128xf32, #tpu.memory_space<vmem>>, %arg7: memref<128x128xf32, #tpu.memory_space<vmem>>, %arg8: memref<1x128xf32, #tpu.memory_space<vmem>>, %arg9: memref<256x128xf32, #tpu.memory_space<vmem>>, %arg10: memref<1x128xf32, #tpu.memory_space<vmem>>, %arg11: memref<8x128xf32, #tpu.memory_space<vmem>>) attributes {dimension_semantics = [#tpu.dimension_semantics<parallel>], iteration_bounds = array<i64: 2>, scalar_prefetch = 0 : i64, scratch_operands = 0 : i64, tpu.core_type = #tpu.core_type<tc>, window_params = [{transform_indices = @transform_0, window_bounds = array<i64: 8, 128>}, {transform_indices = @transform_1, window_bounds = array<i64: 1>}, {pipeline_mode = #tpu.pipeline_mode<synchronous>, transform_indices = @transform_2, window_bounds = array<i64: 128, 128>}, {pipeline_mode = #tpu.pipeline_mode<synchronous>, transform_indices = @transform_3, window_bounds = array<i64: 1, 128>}, {pipeline_mode = #tpu.pipeline_mode<synchronous>, transform_indices = @transform_4, window_bounds = array<i64: 128, 128>}, {pipeline_mode = #tpu.pipeline_mode<synchronous>, transform_indices = @transform_5, window_bounds = array<i64: 1, 128>}, {pipeline_mode = #tpu.pipeline_mode<synchronous>, transform_indices = @transform_6, window_bounds = array<i64: 128, 128>}, {pipeline_mode = #tpu.pipeline_mode<synchronous>, transform_indices = @transform_7, window_bounds = array<i64: 1, 128>}, {pipeline_mode = #tpu.pipeline_mode<synchronous>, transform_indices = @transform_8, window_bounds = array<i64: 256, 128>}, {pipeline_mode = #tpu.pipeline_mode<synchronous>, transform_indices = @transform_9, window_bounds = array<i64: 1, 128>}, {transform_indices = @transform_10, window_bounds = array<i64: 8, 128>}]} {
    %c0 = arith.constant 0 : index
    %c0_0 = arith.constant 0 : index
    %0 = vector.load %arg1[%c0, %c0_0] : memref<8x128xf32, #tpu.memory_space<vmem>>, vector<8x128xf32>
    %c0_1 = arith.constant 0 : index
    %1 = memref.load %arg2[%c0_1] : memref<1xf32, #tpu.memory_space<smem>>
    %c0_2 = arith.constant 0 : index
    %c0_3 = arith.constant 0 : index
    %2 = vector.load %arg3[%c0_2, %c0_3] : memref<128x128xf32, #tpu.memory_space<vmem>>, vector<128x128xf32>
    %cst = arith.constant dense<0.000000e+00> : vector<8x128xf32>
    %3 = tpu.matmul %0, %2, %cst {dimension_numbers = #tpu.dot_dimension_numbers<[1], [0], [0], [1], [0, 0, 1, 1], [], []>} : vector<8x128xf32>, vector<128x128xf32>, vector<8x128xf32> -> vector<8x128xf32>
    %c0_4 = arith.constant 0 : index
    %c0_5 = arith.constant 0 : index
    %4 = vector.load %arg4[%c0_4, %c0_5] : memref<1x128xf32, #tpu.memory_space<vmem>>, vector<1x128xf32>
    %5 = vector.broadcast %4 : vector<1x128xf32> to vector<8x128xf32>
    %6 = arith.addf %3, %5 : vector<8x128xf32>
    %7 = vector.broadcast %1 : f32 to vector<8x128xf32>
    %8 = arith.mulf %6, %7 : vector<8x128xf32>
    %cst_6 = arith.constant dense<0xFF800000> : vector<8xf32>
    %9 = vector.multi_reduction <maximumf>, %8, %cst_6 [1] : vector<8x128xf32> to vector<8xf32>
    %10 = vector.shape_cast %9 : vector<8xf32> to vector<8x1xf32>
    %11 = vector.broadcast %10 : vector<8x1xf32> to vector<8x128xf32>
    %12 = arith.subf %8, %11 : vector<8x128xf32>
    %13 = math.exp %12 : vector<8x128xf32>
    %cst_7 = arith.constant dense<0.000000e+00> : vector<8xf32>
    %14 = vector.multi_reduction <add>, %13, %cst_7 [1] : vector<8x128xf32> to vector<8xf32>
    %15 = vector.shape_cast %14 : vector<8xf32> to vector<8x1xf32>
    %16 = tpu.reciprocal %15 {approx = true} : vector<8x1xf32> -> vector<8x1xf32>
    %17 = vector.broadcast %16 : vector<8x1xf32> to vector<8x128xf32>
    %18 = arith.mulf %13, %17 : vector<8x128xf32>
    %c0_8 = arith.constant 0 : index
    %c0_9 = arith.constant 0 : index
    %19 = vector.load %arg5[%c0_8, %c0_9] : memref<128x128xf32, #tpu.memory_space<vmem>>, vector<128x128xf32>
    %cst_10 = arith.constant dense<0.000000e+00> : vector<8x128xf32>
    %20 = tpu.matmul %18, %19, %cst_10 {dimension_numbers = #tpu.dot_dimension_numbers<[1], [0], [0], [1], [0, 0, 1, 1], [], []>} : vector<8x128xf32>, vector<128x128xf32>, vector<8x128xf32> -> vector<8x128xf32>
    %c0_11 = arith.constant 0 : index
    %c0_12 = arith.constant 0 : index
    %21 = vector.load %arg6[%c0_11, %c0_12] : memref<1x128xf32, #tpu.memory_space<vmem>>, vector<1x128xf32>
    %22 = vector.broadcast %21 : vector<1x128xf32> to vector<8x128xf32>
    %23 = arith.addf %20, %22 : vector<8x128xf32>
    %24 = arith.addf %0, %23 : vector<8x128xf32>
    %c0_13 = arith.constant 0 : index
    %c0_14 = arith.constant 0 : index
    %25 = vector.load %arg7[%c0_13, %c0_14] : memref<128x128xf32, #tpu.memory_space<vmem>>, vector<128x128xf32>
    %cst_15 = arith.constant dense<0.000000e+00> : vector<8x128xf32>
    %26 = tpu.matmul %24, %25, %cst_15 {dimension_numbers = #tpu.dot_dimension_numbers<[1], [0], [0], [1], [0, 0, 1, 1], [], []>} : vector<8x128xf32>, vector<128x128xf32>, vector<8x128xf32> -> vector<8x128xf32>
    %c0_16 = arith.constant 0 : index
    %c0_17 = arith.constant 0 : index
    %27 = vector.load %arg8[%c0_16, %c0_17] : memref<1x128xf32, #tpu.memory_space<vmem>>, vector<1x128xf32>
    %28 = vector.broadcast %27 : vector<1x128xf32> to vector<8x128xf32>
    %29 = arith.addf %26, %28 : vector<8x128xf32>
    %30 = arith.negf %29 : vector<8x128xf32>
    %31 = math.exp %30 : vector<8x128xf32>
    %cst_18 = arith.constant 1.000000e+00 : f32
    %32 = vector.broadcast %cst_18 : f32 to vector<8x128xf32>
    %33 = arith.addf %32, %31 : vector<8x128xf32>
    %34 = arith.divf %32, %33 : vector<8x128xf32>
    %35 = arith.mulf %29, %34 : vector<8x128xf32>
    %c0_19 = arith.constant 0 : index
    %c0_20 = arith.constant 0 : index
    %36 = vector.load %arg9[%c0_19, %c0_20] : memref<256x128xf32, #tpu.memory_space<vmem>>, vector<256x128xf32>
    %37 = tpu.concatenate %24, %35 in 1 : vector<8x128xf32>, vector<8x128xf32> -> vector<8x256xf32>
    %cst_21 = arith.constant dense<0.000000e+00> : vector<8x128xf32>
    %38 = tpu.matmul %37, %36, %cst_21 {dimension_numbers = #tpu.dot_dimension_numbers<[1], [0], [0], [1], [0, 0, 1, 1], [], []>} : vector<8x256xf32>, vector<256x128xf32>, vector<8x128xf32> -> vector<8x128xf32>
    %c0_22 = arith.constant 0 : index
    %c0_23 = arith.constant 0 : index
    %39 = vector.load %arg10[%c0_22, %c0_23] : memref<1x128xf32, #tpu.memory_space<vmem>>, vector<1x128xf32>
    %40 = vector.broadcast %39 : vector<1x128xf32> to vector<8x128xf32>
    %41 = arith.addf %38, %40 : vector<8x128xf32>
    %c0_24 = arith.constant 0 : index
    %c0_25 = arith.constant 0 : index
    %42 = vector.load %arg11[%c0_24, %c0_25] : memref<8x128xf32, #tpu.memory_space<vmem>>, vector<8x128xf32>
    tpu.vector_store %arg11[%c0_24, %c0_25], %41 {strides = array<i32>} : memref<8x128xf32, #tpu.memory_space<vmem>>, vector<8x128xf32>,
    return
  }
  func.func @transform_0(%arg0: i32) -> (i32, i32) {
    %c0_i32 = arith.constant 0 : i32
    %c0_i32_0 = arith.constant 0 : i32
    return %arg0, %c0_i32 : i32, i32
  }
  func.func @transform_1(%arg0: i32) -> i32 {
    %c0_i32 = arith.constant 0 : i32
    %c0_i32_0 = arith.constant 0 : i32
    return %c0_i32 : i32
  }
  func.func @transform_2(%arg0: i32) -> (i32, i32) {
    %c0_i32 = arith.constant 0 : i32
    %c0_i32_0 = arith.constant 0 : i32
    %c0_i32_1 = arith.constant 0 : i32
    return %c0_i32, %c0_i32_0 : i32, i32
  }
  func.func @transform_3(%arg0: i32) -> (i32, i32) {
    %c0_i32 = arith.constant 0 : i32
    %c0_i32_0 = arith.constant 0 : i32
    %c0_i32_1 = arith.constant 0 : i32
    return %c0_i32, %c0_i32_0 : i32, i32
  }
  func.func @transform_4(%arg0: i32) -> (i32, i32) {
    %c0_i32 = arith.constant 0 : i32
    %c0_i32_0 = arith.constant 0 : i32
    %c0_i32_1 = arith.constant 0 : i32
    return %c0_i32, %c0_i32_0 : i32, i32
  }
  func.func @transform_5(%arg0: i32) -> (i32, i32) {
    %c0_i32 = arith.constant 0 : i32
    %c0_i32_0 = arith.constant 0 : i32
    %c0_i32_1 = arith.constant 0 : i32
    return %c0_i32, %c0_i32_0 : i32, i32
  }
  func.func @transform_6(%arg0: i32) -> (i32, i32) {
    %c0_i32 = arith.constant 0 : i32
    %c0_i32_0 = arith.constant 0 : i32
    %c0_i32_1 = arith.constant 0 : i32
    return %c0_i32, %c0_i32_0 : i32, i32
  }
  func.func @transform_7(%arg0: i32) -> (i32, i32) {
    %c0_i32 = arith.constant 0 : i32
    %c0_i32_0 = arith.constant 0 : i32
    %c0_i32_1 = arith.constant 0 : i32
    return %c0_i32, %c0_i32_0 : i32, i32
  }
  func.func @transform_8(%arg0: i32) -> (i32, i32) {
    %c0_i32 = arith.constant 0 : i32
    %c0_i32_0 = arith.constant 0 : i32
    %c0_i32_1 = arith.constant 0 : i32
    return %c0_i32, %c0_i32_0 : i32, i32
  }
  func.func @transform_9(%arg0: i32) -> (i32, i32) {
    %c0_i32 = arith.constant 0 : i32
    %c0_i32_0 = arith.constant 0 : i32
    %c0_i32_1 = arith.constant 0 : i32
    return %c0_i32, %c0_i32_0 : i32, i32
  }
  func.func @transform_10(%arg0: i32) -> (i32, i32) {
    %c0_i32 = arith.constant 0 : i32
    %c0_i32_0 = arith.constant 0 : i32
    return %arg0, %c0_i32 : i32, i32
  }
}

</mosaic_0001>

<bundles_post_ra>
// kernel: tpu_custom_call.1
= control target key start
LH: loop header
LB: loop body
LE: loop exit
PB: predicated region body
PF: predicated region fallthrough
CT: control target
= control target key end

     0   :  { %s2019_s0 = inlined_call_operand.hbm [shape: f32[16,128], index: 0, kind: input, shape index: {}]   ;;  %s2020_s1 = inlined_call_operand.<no memory space> [shape: f32[1], index: 1, kind: input, shape index: {}]   ;;  %s2021_s2 = inlined_call_operand.hbm [shape: f32[128,128], index: 2, kind: input, shape index: {}]   ;;  %s2022_s3 = inlined_call_operand.vmem [shape: f32[1,128], index: 3, kind: input, shape index: {}]   ;;  %s2023_s4 = inlined_call_operand.hbm [shape: f32[128,128], index: 4, kind: input, shape index: {}]   ;;  %s2024_s5 = inlined_call_operand.vmem [shape: f32[1,128], index: 5, kind: input, shape index: {}]   ;;  %s2025_s6 = inlined_call_operand.hbm [shape: f32[128,128], index: 6, kind: input, shape index: {}]   ;;  %s2026_s7 = inlined_call_operand.vmem [shape: f32[1,128], index: 7, kind: input, shape index: {}]   ;;  %s2027_s8 = inlined_call_operand.hbm [shape: f32[256,128], index: 8, kind: input, shape index: {}]   ;;  %s2028_s9 = inlined_call_operand.vmem [shape: f32[1,128], index: 9, kind: input, shape index: {}]   ;;  %s2029_s10 = inlined_call_operand.hbm [shape: f32[16,128], index: 10, kind: output, shape index: {}]  }
   0x1   :  { %2034 = sst [smem:[#allocation17_spill]] %s2021_s2 }
   0x2   :  { %2035 = sst [smem:[#allocation18_spill]] %s2029_s10 }
   0x3   :  { %15 = sst [smem:[#allocation2]] %s2020_s1 }
   0x4   :  { %16 = vsyncpa [#allocation4], 0 }
   0x5   :  { %18 = vsyncpa [#allocation4 + $0x1], 0 }
   0x6   :  { %19 = vsyncpa [#allocation7], 0 }
   0x7   :  { %20 = vsyncpa [#allocation10], 0 }
   0x8   :  { %21 = vsyncpa [#allocation5], 0 }
   0x9   :  { %23 = vsyncpa [#allocation5 + $0x1], 0  ;;  %s1673_s15 = smov 0   ;;  %s1675_s16 = smov 0  }
   0xa   :  { %s1677_s17 = smov 0   ;;  %s1679_s18 = smov 0  }
   0xb LB: > { %s1604_s1 = smov [#allocation6]   ;;  %s1694_s20 = sadd.s32 4294967295, %s1602_s18   ;;  %s1602_s18 = sphi %s1679_s18, %s2058_s18   ;;  %s1598_s17 = sphi %s1677_s17, %s2057_s17   ;;  %s1594_s16 = sphi %s1675_s16, %s2056_s16   ;;  %s1590_s15 = sphi %s1673_s15, %s2055_s15  }
   0xc   : > { %s290_s19 = sshll.u32 %s1604_s1, 4  ;;  %p967_p0 = scmp.ge.s32.totalorder %s1602_s18, 1  ;;  %s1699_s19 = int_to_ptr.vmem [resolvable:$true] %s290_s19 }
   0xd   : > { %p2031_p1 = scmp.eq.s32.totalorder %s1694_s20, 0  ;;  %p275_p2 = scmp.lt.s32.totalorder %s1602_s18, 3 }
   0xe   : > { %s1605_s22 = smov [#allocation9]   ;;  %s1606_s25 = smov [#allocation8]  }
   0xf   : > { %p1701_p3 = pnand %p967_p0, %p275_p2  ;;  %s322_s23 = sshll.u32 %s1605_s22, 4  ;;  %s1714_s23 = int_to_ptr.vmem [resolvable:$true] %s322_s23 }
  0x10   : > { %s306_s26 = sshll.u32 %s1606_s25, 4  ;;  %s2038_s2 = sld [smem:[#allocation17_spill]]  ;;  %s1716_s26 = int_to_ptr.vmem [resolvable:$true] %s306_s26 }
  0x11   : > { %s2036_s21 = scalar_select %p1701_p3, 1, 0 }
  0x12   : > { %p1306_p5 = pneg %p1701_p3 }
  0x14   : > { %p1710_p6 = pnand %p1306_p5, %p2031_p1 }
  0x16   : > { %s1386_s29 = scalar_lea.hbm %s2038_s2, 2048  ;;  %p1726_p8 = pneg %p1710_p6 }
  0x17   : > { %p1387_p7 = scmp.ne.s32.totalorder %s2038_s2, %s1386_s29  ;;  %p1393_p11 = scmp.lt.u32.totalorder %s1386_s29, %s2038_s2 }
  0x19   : > { %p1389_p9 = pnand %p1726_p8, %p1387_p7 }
  0x1b   : > { %p1390_p10 = pneg %p1389_p9 }
  0x1d   : > { %p1395_p12 = pnand %p1393_p11, %p1390_p10 }
  0x1f   : > { %1398 = shalt.err (!%p1395_p12)
}
  0x20   : > { %s1399_s1 = scalar_lea.vmem %s1699_s19, 2048  ;;  %p1407_p5 = scmp.lt.s32.totalorder %s1699_s19, %s1699_s19 }
  0x21   : > { %p1400_p13 = scmp.ne.s32.totalorder %s1699_s19, %s1399_s1  ;;  %p1408_p4 = scmp.lt.s32.totalorder %s1399_s1, %s1399_s1 }
  0x23   : > { %p1402_p0 = pnand %p1400_p13, %p1726_p8  ;;  %p1409_p7 = por %p1408_p4, %p1407_p5 }
  0x25   : > { %p1403_p2 = pneg %p1402_p0 }
  0x27   : > { %p1410_p9 = pnand %p1409_p7, %p1403_p2 }
  0x29   : > { %1413 = shalt.err (!%p1410_p9)
}
  0x2a   : > { %s1607_s22 = smov 128   ;;  %s1608_s25 = smov 8  }
  0x2b   : > { %1309 = dma.hbm_to_vmem [thread:$0]  (!%p1710_p6), %s2038_s2, 2048, %s1699_s19, [#allocation7], %s1607_s22, %s1607_s22, %s1608_s25  }
  0x2c   : > { %s1414_s11 = scalar_lea.hbm %s2025_s6, 2048 }
  0x2d   : > { %p1415_p4 = scmp.ne.s32.totalorder %s2025_s6, %s1414_s11  ;;  %p1421_p12 = scmp.lt.u32.totalorder %s1414_s11, %s2025_s6 }
  0x2f   : > { %p1417_p10 = pnand %p1415_p4, %p1726_p8 }
  0x31   : > { %p1418_p11 = pneg %p1417_p10 }
  0x33   : > { %p1423_p13 = pnand %p1421_p12, %p1418_p11 }
  0x35   : > { %1426 = shalt.err (!%p1423_p13)
}
  0x36   : > { %s1427_s19 = scalar_lea.vmem %s1714_s23, 2048  ;;  %p1435_p7 = scmp.lt.s32.totalorder %s1714_s23, %s1714_s23 }
  0x37   : > { %p1428_p0 = scmp.ne.s32.totalorder %s1714_s23, %s1427_s19  ;;  %p1436_p9 = scmp.lt.s32.totalorder %s1427_s19, %s1427_s19 }
  0x39   : > { %p1430_p2 = pnand %p1428_p0, %p1726_p8  ;;  %p1437_p4 = por %p1436_p9, %p1435_p7 }
  0x3b   : > { %p1431_p5 = pneg %p1430_p2 }
  0x3d   : > { %p1438_p10 = pnand %p1437_p4, %p1431_p5 }
  0x3f   : > { %1441 = shalt.err (!%p1438_p10)
}
  0x40   : > { %1315 = dma.hbm_to_vmem [thread:$0]  (!%p1710_p6), %s2025_s6, 2048, %s1714_s23, [#allocation10], %s1607_s22, %s1607_s22, %s1608_s25  }
  0x41   : > { %s1442_s30 = scalar_lea.hbm %s2023_s4, 2048 }
  0x42   : > { %p1443_p11 = scmp.ne.s32.totalorder %s2023_s4, %s1442_s30  ;;  %p1449_p0 = scmp.lt.u32.totalorder %s1442_s30, %s2023_s4 }
  0x44   : > { %p1445_p12 = pnand %p1443_p11, %p1726_p8 }
  0x46   : > { %p1446_p13 = pneg %p1445_p12 }
  0x48   : > { %p1451_p2 = pnand %p1449_p0, %p1446_p13 }
  0x4a   : > { %1454 = shalt.err (!%p1451_p2)
}
  0x4b   : > { %s1455_s23 = scalar_lea.vmem %s1716_s26, 2048  ;;  %p1463_p4 = scmp.lt.s32.totalorder %s1716_s26, %s1716_s26 }
  0x4c   : > { %p1456_p5 = scmp.ne.s32.totalorder %s1716_s26, %s1455_s23  ;;  %p1464_p10 = scmp.lt.s32.totalorder %s1455_s23, %s1455_s23 }
  0x4e   : > { %p1458_p7 = pnand %p1456_p5, %p1726_p8  ;;  %p1465_p11 = por %p1464_p10, %p1463_p4 }
  0x50   : > { %p1459_p9 = pneg %p1458_p7 }
  0x52   : > { %p1466_p12 = pnand %p1465_p11, %p1459_p9 }
  0x54   : > { %1469 = shalt.err (!%p1466_p12)
}
  0x55   : > { %1312 = dma.hbm_to_vmem [thread:$0]  (!%p1710_p6), %s2023_s4, 2048, %s1716_s26, [#allocation7], %s1607_s22, %s1607_s22, %s1608_s25  }
  0x56   : > { %s1609_s27 = smov [#allocation11]   ;;  %s1470_s11 = scalar_lea.hbm %s2027_s8, 4096 }
  0x57   : > { %s338_s28 = sshll.u32 %s1609_s27, 4  ;;  %p1471_p13 = scmp.ne.s32.totalorder %s2027_s8, %s1470_s11  ;;  %s339_s28 = int_to_ptr.vmem [resolvable:$true] %s338_s28 }
  0x58   : > { %p1477_p5 = scmp.lt.u32.totalorder %s1470_s11, %s2027_s8 }
  0x59   : > { %p1473_p0 = pnand %p1471_p13, %p1726_p8 }
  0x5b   : > { %p1474_p2 = pneg %p1473_p0 }
  0x5d   : > { %p1479_p7 = pnand %p1477_p5, %p1474_p2 }
  0x5f   : > { %1482 = shalt.err (!%p1479_p7)
}
  0x60   : > { %s1483_s26 = scalar_lea.vmem %s339_s28, 4096  ;;  %p1491_p11 = scmp.lt.s32.totalorder %s339_s28, %s339_s28 }
  0x61   : > { %p1484_p9 = scmp.ne.s32.totalorder %s339_s28, %s1483_s26  ;;  %p1492_p12 = scmp.lt.s32.totalorder %s1483_s26, %s1483_s26 }
  0x63   : > { %p1486_p4 = pnand %p1484_p9, %p1726_p8  ;;  %p1493_p1 = por %p1492_p12, %p1491_p11 }
  0x65   : > { %p1487_p10 = pneg %p1486_p4 }
  0x67   : > { %p1494_p3 = pnand %p1493_p1, %p1487_p10 }
  0x69   : > { %1497 = shalt.err (!%p1494_p3)
}
  0x6a   : > { %1318 = dma.hbm_to_vmem [thread:$0]  (!%p1710_p6), %s2027_s8, 4096, %s339_s28, [#allocation10], %s1607_s22, %s1607_s22, %s1608_s25  }
  0x6b   : > { %s966_s24 = sadd.s32 4294967294, %s1602_s18   ;;  %s1825_s12 = sadd.s32 1, %s1602_s18  }
  0x6c   : > { %s33_s27 = ssub.s32 %s1602_s18, %s1825_s12  ;;  %s36_s29 = sadd.s32 1, %s1598_s17 }
  0x6d   : > { %p34_p1 = scmp.eq.s32.totalorder %s33_s27, 0  ;;  %p43_p3 = scmp.ne.s32.totalorder %s1598_s17, %s1594_s16 }
  0x6e   : > { %p44_p8 = scmp.eq.s32.totalorder %s1602_s18, 0  ;;  %p49_p13 = scmp.ne.s32.totalorder %s1594_s16, %s1590_s15 }
  0x6f   : > { %s1836_s30 = scalar_select %p34_p1, %s1598_s17, %s36_s29  }
  0x70   : > { %p1838_p0 = por %p44_p8, %p43_p3  ;;  %p2041_p2 = scmp.eq.s32.totalorder %s1694_s20, 0 }
  0x71   : > { %p262_p5 = scmp.eq.s32.totalorder %s1694_s20, 1  ;;  %p268_p7 = scmp.eq.s32.totalorder %s966_s24, 1 }
  0x72   : > { %p1844_p6 = por %p2041_p2, %p49_p13  ;;  %p1331_p9 = scmp.lt.s32.totalorder %s1602_s18, 2 }
  0x73   : > { %s355_s25 = sand.u32 1, %s1598_s17   ;;  %p1851_p4 = por %p262_p5, %p43_p3 }
  0x74   : > { %p1855_p10 = por %p268_p7, %p49_p13  ;;  %s973_s14 = sshll.u32 %s355_s25, 3 }
  0x75   : > { %s2043_s28 = scalar_select %p1851_p4, 1, 0 }
  0x76   : > { %s2044_s13 = scalar_select %p1855_p10, 1, 0 }
  0x77   : > { %s974_s1 = sshll.u32 %s1602_s18, 7  ;;  %s359_s10 = scalar_lea.vmem [#allocation3], %s973_s14 }
  0x78   : > { %s1863_s19 = scalar_lea.hbm %s2019_s0, %s974_s1  ;;  %s366_s24 = sshll.u32 %s359_s10, 4  ;;  %s1865_s24 = int_to_ptr.vmem [resolvable:$true] %s366_s24 }
  0x79   : > { %p1869_p11 = pnand %p1331_p9, %p1838_p0  ;;  %s356_s29 = scalar_lea.sflag [#allocation4], %s355_s25 }
  0x7a   : > { %s1498_s2 = scalar_lea.hbm %s1863_s19, 128  ;;  %s1503_s23 = scalar_lea.hbm %s2019_s0, 256 }
  0x7b   : > { %p1499_p12 = scmp.ne.s32.totalorder %s1863_s19, %s1498_s2  ;;  %p1500_p1 = pneg %p1869_p11 }
  0x7c   : > { %p1504_p13 = scmp.lt.u32.totalorder %s1863_s19, %s2019_s0  ;;  %p1505_p0 = scmp.lt.u32.totalorder %s1503_s23, %s1498_s2 }
  0x7d   : > { %p1501_p3 = pnand %p1500_p1, %p1499_p12  ;;  %p1507_p5 = scmp.lt.u32.totalorder %s1498_s2, %s1863_s19 }
  0x7e   : > { %p1506_p2 = por %p1505_p0, %p1504_p13 }
  0x7f   : > { %p1502_p8 = pneg %p1501_p3 }
  0x80   : > { %p1508_p7 = por %p1507_p5, %p1506_p2 }
  0x82   : > { %p1509_p9 = pnand %p1508_p7, %p1502_p8 }
  0x84   : > { %1512 = shalt.err (!%p1509_p9)
}
  0x85   : > { %s1513_s25 = scalar_lea.vmem %s1865_s24, 128  ;;  %s1610_s10 = smov [#allocation3]  }
  0x86   : > { %p1514_p12 = scmp.ne.s32.totalorder %s1865_s24, %s1513_s25  ;;  %s1518_s14 = sshll.u32 %s1610_s10, 4  ;;  %s1519_s14 = int_to_ptr.vmem [resolvable:$false] %s1518_s14 }
  0x87   : > { %s1520_s1 = scalar_lea.vmem %s1519_s14, 256  ;;  %p1521_p4 = scmp.lt.s32.totalorder %s1865_s24, %s1519_s14 }
  0x88   : > { %p1516_p3 = pnand %p1514_p12, %p1500_p1  ;;  %p1522_p13 = scmp.lt.s32.totalorder %s1520_s1, %s1513_s25 }
  0x8a   : > { %p1517_p10 = pneg %p1516_p3  ;;  %p1523_p0 = por %p1522_p13, %p1521_p4 }
  0x8c   : > { %p1524_p2 = pnand %p1523_p0, %p1517_p10 }
  0x8e   : > { %1527 = shalt.err (!%p1524_p2)
}
  0x8f   : > { %1322 = dma.hbm_to_vmem [thread:$0]  (!%p1869_p11), %s1863_s19, 128, %s1865_s24, %s356_s29  }
  0x90   : > { %p2046_p8 = scmp.ne.s32.totalorder %s2036_s21, 0 }
  0x91   : > { %s1901_s2 = sand.u32 (!%p2046_p8), 1, %s1594_s16  }
  0x92   : > { %375 = sbr.rel (%p2046_p8) target bundleno = 1412 (0x584), region = 60  ;;  %s976_s23 = sshll.u32 (!%p2046_p8), %s1901_s2, 3 }
  0x93   : > { %s378_s11 = scalar_lea.sflag (!%p2046_p8), [#allocation4], %s1901_s2  ;;  %s1907_s26 = scalar_lea.vmem (!%p2046_p8), [#allocation3], %s976_s23 }
  0x99   : > { %1573 = dma.done.wait (%p1844_p6), %s378_s11, 128  }
  0x9a   : > { %1575 = vsyncadd (%p1844_p6), %s378_s11, 4294967168  ;;  %p2047_p4 = scmp.eq.s32.totalorder %s1694_s20, 0 }
  0x9c   : > { %1577 = dma.done.wait (%p2047_p4), [#allocation7], 4096   ;;  %p2048_p10 = pmov %p2047_p4 }
  0x9d   : > { %p2049_p11 = pmov %p2047_p4 }
  0x9e   : > { %1579 = vsyncadd (%p2048_p10), [#allocation7], 4294963200 }
  0x9f   : > { %1581 = dma.done.wait (%p2049_p11), [#allocation10], 6144   ;;  %p2050_p1 = pmov %p2047_p4 }
  0xa0   : > { %v1611_v0 = vmov 0.0|0.0   ;;  %vm1612_vm0 = vmmov 0   ;;  %v1613_v1 = vmov 0.0   ;;  %v436_v2 = vld [vmem:[#allocation6] sm:$0xff]  ;;  %v437_v3 = vld [vmem:[#allocation6 + $0x8] sm:$0xff]  ;;  %v438_v4 = vld [vmem:[#allocation6 + $0x10] sm:$0xff] }
  0xa1   : > { %1583 = vsyncadd (%p2050_p1), [#allocation10], 4294961152  ;;  %1182 = vmatprep.subr.bf16.mxu0 %v1611_v0  ;;  %1109 = vmatprep.mubr.msk.f32.mxu0 %vm1612_vm0, %v1613_v1  ;;  %v1183_v5 = vpack.c.bf16 %v437_v3, %v436_v2  ;;  %v439_v6 = vld [vmem:[#allocation6 + $0x18] sm:$0xff]  ;;  %v440_v8 = vld [vmem:[#allocation6 + $0x20] sm:$0xff]  ;;  %s435_s21 = sld [smem:[#allocation2]]  ;;  %s988_s1 = sshll.u32 %s1694_s20, 7 }
  0xa2   : > { %1206 = vmatprep.subr.bf16.mxu1 %v1611_v0  ;;  %1144 = vmatprep.mubr.msk.f32.mxu1 %vm1612_vm0, %v1613_v1  ;;  %v1186_v7 = vpack.c.bf16 %v439_v6, %v438_v4  ;;  %v441_v9 = vld [vmem:[#allocation6 + $0x28] sm:$0xff]  ;;  %v442_v11 = vld [vmem:[#allocation6 + $0x30] sm:$0xff]  ;;  %v443_v12 = vld [vmem:[#allocation6 + $0x38] sm:$0xff]  ;;  %s433_s11 = scalar_lea.vmem [#allocation12], %s976_s23  ;;  %s2051_s19 = sld [smem:[#allocation18_spill]] }
  0xa3   : > { %1184 = vmatpush3.bf16.msra.mxu0 %v1183_v5  ;;  %v1189_v10 = vpack.c.bf16 %v441_v9, %v440_v8  ;;  %v1192_v13 = vpack.c.bf16 %v443_v12, %v442_v11  ;;  %v444_v14 = vld [vmem:[#allocation6 + $0x40] sm:$0xff]  ;;  %v445_v15 = vld [vmem:[#allocation6 + $0x48] sm:$0xff]  ;;  %v446_v17 = vld [vmem:[#allocation6 + $0x50] sm:$0xff]  ;;  %s845_s27 = scalar_lea.sflag [#allocation5], %s1901_s2  ;;  %p2052_p5 = scmp.ne.s32.totalorder %s2043_s28, 0 }
  0xa4   : > { %1185 = vmatprep.subr.bf16.mxu0 %v1611_v0  ;;  %v1195_v16 = vpack.c.bf16 %v445_v15, %v444_v14  ;;  %v447_v18 = vld [vmem:[#allocation6 + $0x58] sm:$0xff]  ;;  %v448_v20 = vld [vmem:[#allocation6 + $0x60] sm:$0xff]  ;;  %v449_v21 = vld [vmem:[#allocation6 + $0x68] sm:$0xff]  ;;  %s1614_s20 = smov [#allocation12]  }
  0xa5   : > { %v1198_v19 = vpack.c.bf16 %v447_v18, %v446_v17  ;;  %v1201_v22 = vpack.c.bf16 %v449_v21, %v448_v20  ;;  %v450_v23 = vld [vmem:[#allocation6 + $0x70] sm:$0xff]  ;;  %v451_v24 = vld [vmem:[#allocation6 + $0x78] sm:$0xff]  ;;  %v540_v33 = vld [vmem:[#allocation8] sm:$0xff]  ;;  %s1532_s23 = sshll.u32 %s1614_s20, 4  ;;  %s1533_s23 = int_to_ptr.vmem [resolvable:$false] %s1532_s23 }
  0xa6   : > { %v1204_v25 = vpack.c.bf16 %v451_v24, %v450_v23  ;;  %v1933_v26 = vld [vmem:[%s1907_s26] sm:$0xff]  ;;  %v541_v34 = vld [vmem:[#allocation8 + $0x8] sm:$0xff]  ;;  %v544_v39 = vld [vmem:[#allocation8 + $0x20] sm:$0xff]  ;;  %s858_s26 = sshll.u32 %s433_s11, 4  ;;  %s1534_s25 = scalar_lea.vmem %s1533_s23, 256  ;;  %s1977_s26 = int_to_ptr.vmem [resolvable:$true] %s858_s26 }
  0xa7   : > { %1187 = vmatpush3.bf16.msra.mxu0 %v1186_v7  ;;  %v982_v27 = vld [vmem:[%s2022_s3] ss:$0 sm:$0xff]  ;;  %v529_v29 = vstv %s435_s21  ;;  %v1207_v36 = vpack.c.bf16 %v541_v34, %v540_v33  ;;  %v543_v37 = vld [vmem:[#allocation8 + $0x18] sm:$0xff]  ;;  %v545_v40 = vld [vmem:[#allocation8 + $0x28] sm:$0xff]  ;;  %s1528_s29 = scalar_lea.vmem %s1977_s26, 128  ;;  %p1535_p12 = scmp.lt.s32.totalorder %s1977_s26, %s1533_s23 }
  0xa8   : > { %1188 = vmatprep.subr.bf16.mxu0 %v1611_v0  ;;  %v542_v35 = vld [vmem:[#allocation8 + $0x10] sm:$0xff]  ;;  %v1213_v41 = vpack.c.bf16 %v545_v40, %v544_v39  ;;  %v547_v43 = vld [vmem:[#allocation8 + $0x38] sm:$0xff]  ;;  %v548_v45 = vld [vmem:[#allocation8 + $0x40] sm:$0xff]  ;;  %s1975_s24 = scalar_lea.hbm %s2051_s19, %s988_s1  ;;  %p1529_p6 = scmp.ne.s32.totalorder %s1977_s26, %s1528_s29 }
  0xa9   : > { %1208 = vmatpush3.bf16.msra.mxu1 %v1207_v36  ;;  %v1210_v38 = vpack.c.bf16 %v543_v37, %v542_v35  ;;  %v546_v42 = vld [vmem:[#allocation8 + $0x30] sm:$0xff]  ;;  %v549_v46 = vld [vmem:[#allocation8 + $0x48] sm:$0xff]  ;;  %v551_v53 = vld [vmem:[#allocation8 + $0x58] sm:$0xff]  ;;  %p1536_p3 = scmp.lt.s32.totalorder %s1534_s25, %s1528_s29 }
  0xaa   : > { %1209 = vmatprep.subr.bf16.mxu1 %v1611_v0  ;;  %v1216_v44 = vpack.c.bf16 %v547_v43, %v546_v42  ;;  %v1219_v47 = vpack.c.bf16 %v549_v46, %v548_v45  ;;  %v550_v52 = vld [vmem:[#allocation8 + $0x50] sm:$0xff]  ;;  %v552_v55 = vld [vmem:[#allocation8 + $0x60] sm:$0xff]  ;;  %v553_v56 = vld [vmem:[#allocation8 + $0x68] sm:$0xff]  ;;  %p1530_p7 = pnand %p1529_p6, %p2052_p5 }
  0xab   : > { %1190 = vmatpush3.bf16.msra.mxu0 %v1189_v10  ;;  %v1222_v54 = vpack.c.bf16 %v551_v53, %v550_v52  ;;  %v1225_v57 = vpack.c.bf16 %v553_v56, %v552_v55  ;;  %v554_v58 = vld [vmem:[#allocation8 + $0x70] sm:$0xff]  ;;  %v555_v59 = vld [vmem:[#allocation8 + $0x78] sm:$0xff]  ;;  %v634_v61 = vld [vmem:[#allocation9] sm:$0xff]  ;;  %p1537_p13 = por %p1536_p3, %p1535_p12 }
  0xac   : > { %1191 = vmatprep.subr.bf16.mxu0 %v1611_v0  ;;  %v1228_v60 = vpack.c.bf16 %v555_v59, %v554_v58  ;;  %v635_v62 = vld [vmem:[#allocation9 + $0x8] sm:$0xff]  ;;  %v636_v63 = vld [vmem:[#allocation9 + $0x10] sm:$0xff]  ;;  %v637_v2 = vld [vmem:[#allocation9 + $0x18] sm:$0xff]  ;;  %p1531_p9 = pneg %p1530_p7 }
  0xad   : > { %1211 = vmatpush3.bf16.msra.mxu1 %v1210_v38  ;;  %v1234_v3 = vpack.c.bf16 %v637_v2, %v636_v63  ;;  %v638_v4 = vld [vmem:[#allocation9 + $0x20] sm:$0xff]  ;;  %v639_v5 = vld [vmem:[#allocation9 + $0x28] sm:$0xff]  ;;  %v640_v7 = vld [vmem:[#allocation9 + $0x30] sm:$0xff] }
  0xae   : > { %1212 = vmatprep.subr.bf16.mxu1 %v1611_v0  ;;  %v1237_v6 = vpack.c.bf16 %v639_v5, %v638_v4  ;;  %v641_v8 = vld [vmem:[#allocation9 + $0x38] sm:$0xff]  ;;  %v642_v10 = vld [vmem:[#allocation9 + $0x40] sm:$0xff]  ;;  %v643_v11 = vld [vmem:[#allocation9 + $0x48] sm:$0xff]  ;;  %p1538_p0 = pnand %p1537_p13, %p1531_p9 }
  0xaf   : > { %1193 = vmatpush3.bf16.msra.mxu0 %v1192_v13  ;;  %v1240_v9 = vpack.c.bf16 %v641_v8, %v640_v7  ;;  %v1243_v12 = vpack.c.bf16 %v643_v11, %v642_v10  ;;  %v644_v13 = vld [vmem:[#allocation9 + $0x50] sm:$0xff]  ;;  %v645_v14 = vld [vmem:[#allocation9 + $0x58] sm:$0xff]  ;;  %v647_v17 = vld [vmem:[#allocation9 + $0x68] sm:$0xff] }
  0xb0   : > { %1194 = vmatprep.subr.bf16.mxu0 %v1611_v0  ;;  %v1246_v15 = vpack.c.bf16 %v645_v14, %v644_v13  ;;  %v649_v23 = vld [vmem:[#allocation9 + $0x78] sm:$0xff]  ;;  %v734_v33 = vld [vmem:[#allocation11] sm:$0xff]  ;;  %v735_v34 = vld [vmem:[#allocation11 + $0x8] sm:$0xff] }
  0xb1   : > { %1214 = vmatpush3.bf16.msra.mxu1 %v1213_v41  ;;  %v1256_v35 = vpack.c.bf16 %v735_v34, %v734_v33  ;;  %v752_v36 = vld [vmem:[#allocation11 + $0x90] sm:$0xff]  ;;  %v753_v37 = vld [vmem:[#allocation11 + $0x98] sm:$0xff]  ;;  %v755_v42 = vld [vmem:[#allocation11 + $0xa8] sm:$0xff] }
  0xb2   : > { %1215 = vmatprep.subr.bf16.mxu1 %v1611_v0  ;;  %v1258_v38 = vpack.c.bf16 %v753_v37, %v752_v36  ;;  %v736_v39 = vld [vmem:[#allocation11 + $0x10] sm:$0xff]  ;;  %v737_v40 = vld [vmem:[#allocation11 + $0x18] sm:$0xff]  ;;  %v739_v45 = vld [vmem:[#allocation11 + $0x28] sm:$0xff] }
  0xb3   : > { %1196 = vmatpush3.bf16.msra.mxu0 %v1195_v16  ;;  %v646_v16 = vld [vmem:[#allocation9 + $0x60] sm:$0xff]  ;;  %v1260_v41 = vpack.c.bf16 %v737_v40, %v736_v39  ;;  %v760_v59 = vld [vmem:[#allocation11 + $0xd0] sm:$0xff]  ;;  %v745_v63 = vld [vmem:[#allocation11 + $0x58] sm:$0xff] }
  0xb4   : > { %1197 = vmatprep.subr.bf16.mxu0 %v1611_v0  ;;  %v1249_v18 = vpack.c.bf16 %v647_v17, %v646_v16  ;;  %v758_v53 = vld [vmem:[#allocation11 + $0xc0] sm:$0xff]  ;;  %v764_v8 = vld [vmem:[#allocation11 + $0xf0] sm:$0xff] }
  0xb5   : > { %1217 = vmatpush3.bf16.msra.mxu1 %v1216_v44  ;;  %v738_v44 = vld [vmem:[#allocation11 + $0x20] sm:$0xff]  ;;  %v748_v11 = vld [vmem:[#allocation11 + $0x70] sm:$0xff] }
  0xb6   : > { %1218 = vmatprep.subr.bf16.mxu1 %v1611_v0  ;;  %v1264_v46 = vpack.c.bf16 %v739_v45, %v738_v44  ;;  %v742_v56 = vld [vmem:[#allocation11 + $0x40] sm:$0xff]  ;;  %v984_v14 = vld [vmem:[%s2026_s7] ss:$0 sm:$0xff] }
  0xb7   : > { %1199 = vmatpush3.bf16.msra.mxu0 %v1198_v19  ;;  %v762_v2 = vld [vmem:[#allocation11 + $0xe0] sm:$0xff] }
  0xb8   : > { %1200 = vmatprep.subr.bf16.mxu0 %v1611_v0  ;;  %v746_v5 = vld [vmem:[#allocation11 + $0x60] sm:$0xff] }
  0xb9   : > { %1220 = vmatpush3.bf16.msra.mxu1 %v1219_v47  ;;  %v756_v47 = vld [vmem:[#allocation11 + $0xb0] sm:$0xff] }
  0xba   : > { %1221 = vmatprep.subr.bf16.mxu1 %v1611_v0 }
  0xbb   : > { %1202 = vmatpush3.bf16.msra.mxu0 %v1201_v22  ;;  %v648_v22 = vld [vmem:[#allocation9 + $0x70] sm:$0xff] }
  0xbc   : > { %1203 = vmatprep.subr.bf16.mxu0 %v1611_v0  ;;  %v1252_v24 = vpack.c.bf16 %v649_v23, %v648_v22 }
  0xbd   : > { %1223 = vmatpush3.bf16.msra.mxu1 %v1222_v54  ;;  %v759_v54 = vld [vmem:[#allocation11 + $0xc8] sm:$0xff] }
  0xbe   : > { %1224 = vmatprep.subr.bf16.mxu1 %v1611_v0  ;;  %v1270_v55 = vpack.c.bf16 %v759_v54, %v758_v53 }
  0xbf   : > { %1205 = vmatpush3.bf16.msra.mxu0 %v1204_v25  ;;  %v983_v25 = vld [vmem:[%s2024_s5] ss:$0 sm:$0xff] }
  0xc0   : > { %1230 = vmatprep.subr.bf16.mxu0 %v1611_v0 }
  0xc1   : > { %1226 = vmatpush3.bf16.msra.mxu1 %v1225_v57  ;;  %v743_v57 = vld [vmem:[#allocation11 + $0x48] sm:$0xff] }
  0xc2   : > { %1110 = vmatmul.mubr.f32.vlgmr.msra.gmra.mrb[0].mxu0 %v1933_v26  ;;  %1227 = vmatprep.subr.bf16.mxu1 %v1611_v0  ;;  %v1272_v58 = vpack.c.bf16 %v743_v57, %v742_v56 }
  0xc3   : > { %1179 = vmatprep.mubr.msk.f32.mxu0 %vm1612_vm0, %v1613_v1  ;;  %v1231_v1 = vpack.c.bf16 %v635_v62, %v634_v61  ;;  %v744_v62 = vld [vmem:[#allocation11 + $0x50] sm:$0xff] }
  0xc5   : > { %1229 = vmatpush3.bf16.msra.mxu1 %v1228_v60  ;;  %1232 = vmatpush3.bf16.msra.mxu0 %v1231_v1  ;;  %v761_v60 = vld [vmem:[#allocation11 + $0xd8] sm:$0xff]  ;;  %v1276_v1 = vpack.c.bf16 %v745_v63, %v744_v62 }
  0xc6   : > { %1233 = vmatprep.subr.bf16.mxu0 %v1611_v0  ;;  %v1274_v61 = vpack.c.bf16 %v761_v60, %v760_v59 }
  0xc9   : > { %1235 = vmatpush3.bf16.msra.mxu0 %v1234_v3  ;;  %v763_v3 = vld [vmem:[#allocation11 + $0xe8] sm:$0xff] }
  0xca   : > { %1236 = vmatprep.subr.bf16.mxu0 %v1611_v0  ;;  %v1278_v4 = vpack.c.bf16 %v763_v3, %v762_v2 }
  0xcd   : > { %1238 = vmatpush3.bf16.msra.mxu0 %v1237_v6  ;;  %v747_v6 = vld [vmem:[#allocation11 + $0x68] sm:$0xff] }
  0xce   : > { %1239 = vmatprep.subr.bf16.mxu0 %v1611_v0  ;;  %v1280_v7 = vpack.c.bf16 %v747_v6, %v746_v5 }
  0xd1   : > { %1241 = vmatpush3.bf16.msra.mxu0 %v1240_v9  ;;  %v765_v9 = vld [vmem:[#allocation11 + $0xf8] sm:$0xff] }
  0xd2   : > { %1242 = vmatprep.subr.bf16.mxu0 %v1611_v0  ;;  %v1282_v10 = vpack.c.bf16 %v765_v9, %v764_v8 }
  0xd5   : > { %1244 = vmatpush3.bf16.msra.mxu0 %v1243_v12  ;;  %v749_v12 = vld [vmem:[#allocation11 + $0x78] sm:$0xff] }
  0xd6   : > { %1245 = vmatprep.subr.bf16.mxu0 %v1611_v0  ;;  %v1284_v13 = vpack.c.bf16 %v749_v12, %v748_v11 }
  0xd9   : > { %1247 = vmatpush3.bf16.msra.mxu0 %v1246_v15 }
  0xda   : > { %1248 = vmatprep.subr.bf16.mxu0 %v1611_v0 }
  0xdd   : > { %1250 = vmatpush3.bf16.msra.mxu0 %v1249_v18 }
  0xde   : > { %1251 = vmatprep.subr.bf16.mxu0 %v1611_v0  ;;  %v750_v0 = vld [vmem:[#allocation11 + $0x80] sm:$0xff] }
  0xe1   : > { %1253 = vmatpush3.bf16.msra.mxu0 %v1252_v24  ;;  %v986_v24 = vld [vmem:[%s2028_s9] ss:$0 sm:$0xff] }
 0x195   : > { %v525_v28 = vpop.f32.mrb[0].mxu0 }
 0x196   : > { %v526_v30 = vadd.f32 %v982_v27, %v525_v28  ;;  %v1111_v31 = vpop.f32.mrb[1].mxu0 }
 0x197   : > { %v751_v31 = vld [vmem:[#allocation11 + $0x88] sm:$0xff] }
 0x198   : > { %v530_v32 = vmul.f32 %v529_v29, %v526_v30 }
 0x19a   : > { %531 = vmax.xlane.f32.xlu0 %v530_v32 }
 0x227   : > { %v532_v48 = vpop.xlane.xlu0 %531 }
 0x228   : > { %v533_v49 = vsub.f32 %v530_v32, %v532_v48  ;;  %v1254_v32 = vpack.c.bf16 %v751_v31, %v750_v0  ;;  %v757_v48 = vld [vmem:[#allocation11 + $0xb8] sm:$0xff] }
 0x22a   : > { %v534_v50 = vmul.f32 1.442695, %v533_v49  ;;  %1255 = vmatprep.subr.bf16.mxu1 %v1254_v32  ;;  %v1266_v49 = vpack.c.bf16 %v757_v48, %v756_v47 }
 0x22c   : > { %1378 = vpow2.f32 %v534_v50  ;;  %v740_v50 = vld [vmem:[#allocation11 + $0x30] sm:$0xff] }
 0x236   : > { %v1379_v51 = vpop.eup %1378 }
 0x237   : > { %536 = vadd.xlane.f32.xlu0 %v1379_v51 }
 0x2c4   : > { %v537_v19 = vpop.xlane.xlu0 %536 }
 0x2c5   : > { %1380 = vrcp.f32 %v537_v19 }
 0x2cf   : > { %v1381_v20 = vpop.eup %1380 }
 0x2d0   : > { %v539_v21 = vmul.f32 %v1381_v20, %v1379_v51  ;;  %v741_v51 = vld [vmem:[#allocation11 + $0x38] sm:$0xff] }
 0x2d1   : > { %v1268_v52 = vpack.c.bf16 %v741_v51, %v740_v50 }
 0x2d2   : > { %1145 = vmatmul.mubr.f32.vlgmr.msra.gmra.mrb[0].mxu1 %v539_v21 }
 0x2d3   : > { %1257 = vmatpush3.bf16.msra.mxu1 %v1256_v35 }
 0x2d4   : > { %1259 = vmatprep.subr.bf16.mxu1 %v1258_v38 }
 0x2d7   : > { %1261 = vmatpush3.bf16.msra.mxu1 %v1260_v41 }
 0x3a5   : > { %v629_v27 = vpop.f32.mrb[0].mxu1 }
 0x3a6   : > { %v630_v28 = vadd.f32 %v983_v25, %v629_v27  ;;  %v1146_v29 = vpop.f32.mrb[1].mxu1 }
 0x3a8   : > { %v1959_v30 = vadd.f32 %v630_v28, %v1933_v26  ;;  %v754_v26 = vld [vmem:[#allocation11 + $0xa0] sm:$0xff] }
 0x3a9   : > { %v1262_v43 = vpack.c.bf16 %v755_v42, %v754_v26 }
 0x3aa   : > { %1180 = vmatmul.mubr.f32.vlgmr.msra.gmra.mrb[2].mxu0 %v1959_v30 }
 0x3ab   : > { %1263 = vmatprep.subr.bf16.mxu1 %v1262_v43 }
 0x3ac   : > { %1265 = vmatpush3.bf16.msra.mxu1 %v1264_v46 }
 0x3ad   : > { %1267 = vmatprep.subr.bf16.mxu1 %v1266_v49 }
 0x3b0   : > { %1269 = vmatpush3.bf16.msra.mxu1 %v1268_v52 }
 0x3b1   : > { %1271 = vmatprep.subr.bf16.mxu1 %v1270_v55 }
 0x3b4   : > { %1273 = vmatpush3.bf16.msra.mxu1 %v1272_v58 }
 0x3b5   : > { %1275 = vmatprep.subr.bf16.mxu1 %v1274_v61 }
 0x3b8   : > { %1277 = vmatpush3.bf16.msra.mxu1 %v1276_v1 }
 0x3b9   : > { %1279 = vmatprep.subr.bf16.mxu1 %v1278_v4 }
 0x3bc   : > { %1281 = vmatpush3.bf16.msra.mxu1 %v1280_v7 }
 0x3bd   : > { %1283 = vmatprep.subr.bf16.mxu1 %v1282_v10 }
 0x3c0   : > { %1285 = vmatpush3.bf16.msra.mxu1 %v1284_v13 }
 0x47d   : > { %v723_v15 = vpop.f32.mrb[2].mxu0 }
 0x47e   : > { %v724_v16 = vadd.f32 %v984_v14, %v723_v15  ;;  %v1181_v17 = vpop.f32.mrb[3].mxu0 }
 0x480   : > { %v985_v18 = vmul.f32 -1.442695, %v724_v16 }
 0x482   : > { %1382 = vpow2.f32 %v985_v18 }
 0x48c   : > { %v1383_v19 = vpop.eup %1382 }
 0x48d   : > { %v730_v20 = vadd.f32 1.0, %v1383_v19 }
 0x48f   : > { %1384 = vrcp.f32 %v730_v20 }
 0x499   : > { %v1385_v21 = vpop.eup %1384 }
 0x49a   : > { %v733_v22 = vmul.f32 %v1385_v21, %v724_v16 }
 0x49c   : > { %837 = vmatprep.mubr.f32.mxu1 %v733_v22 }
 0x49d   : > { %838 = vmatmul.mubr.f32.vlgmr.msra.gmra.mrb[2].mxu1 %v1959_v30 }
 0x570   : > { %v1074_v23 = vpop.f32.mrb[2].mxu1 }
 0x571   : > { %v1075_v25 = vpop.f32.mrb[3].mxu1 }
 0x572   : > { %v1076_v27 = vadd.f32 %v1075_v25, %v1074_v23 }
 0x574   : > { %v840_v28 = vadd.f32 %v1076_v27, %v986_v24 }
 0x576   : > { %843 = vst [vmem:[%s433_s11] sm:$0xff] %v840_v28 }
 0x577   : > { %1541 = shalt.err (!%p1538_p0)
}
 0x578   : > { %s1542_s2 = scalar_lea.hbm %s1975_s24, 128  ;;  %s1546_s1 = scalar_lea.hbm %s2051_s19, 256 }
 0x579   : > { %p1543_p2 = scmp.ne.s32.totalorder %s1975_s24, %s1542_s2  ;;  %p1547_p10 = scmp.lt.u32.totalorder %s1975_s24, %s2051_s19 }
 0x57a   : > { %p1548_p11 = scmp.lt.u32.totalorder %s1546_s1, %s1542_s2  ;;  %p1550_p6 = scmp.lt.u32.totalorder %s1542_s2, %s1975_s24 }
 0x57b   : > { %p1544_p8 = pnand %p1543_p2, %p2052_p5 }
 0x57c   : > { %p1549_p1 = por %p1548_p11, %p1547_p10 }
 0x57d   : > { %p1545_p4 = pneg %p1544_p8 }
 0x57e   : > { %p1551_p7 = por %p1550_p6, %p1549_p1 }
 0x580   : > { %p1552_p9 = pnand %p1551_p7, %p1545_p4 }
 0x582   : > { %1555 = shalt.err (!%p1552_p9)
}
 0x583   : > { %1304 = dma.vmem_to_hbm [thread:$0]  (%p2052_p5), %s1977_s26, 128, %s1975_s24, %s845_s27  }
 0x584 PF: > { %s870_s22 = sand.u32 1, %s1590_s15   ;;  %p2053_p12 = scmp.ne.s32.totalorder %s2044_s13, 0 }
 0x585   : > { %p2054_p3 = scmp.ge.s32.totalorder %s1602_s18, 2  ;;  %s871_s29 = scalar_lea.sflag [#allocation5], %s870_s22 }
 0x587   : > { %p1324_p13 = pnand %p2054_p3, %p2053_p12 }
 0x589   : > { %1585 = dma.done.wait (!%p1324_p13), %s871_s29, 128  }
 0x58a   : > { %1587 = vsyncadd (!%p1324_p13), %s871_s29, 4294967168  ;;  %p26_p0 = scmp.ge.s32.totalorder %s1825_s12, 4   ;;  %s2055_s15 = smov %s1594_s16 }
 0x58b   : > { %s2056_s16 = smov %s1598_s17  ;;  %s2057_s17 = smov %s1836_s30 }
 0x58c   : > { %s2058_s18 = smov %s1825_s12  ;;  %28 = sbr.rel (!%p26_p0) target bundleno = 11 (0xb), region = 121 }
 0x593   :  { %876 = vsyncpa [#allocation4], 1 }
 0x594   :  { %878 = vsyncpa [#allocation4 + $0x1], 1 }
 0x595   :  { %879 = vsyncpa [#allocation7], 1 }
 0x596   :  { %880 = vsyncpa [#allocation10], 1 }
 0x597   :  { %881 = vsyncpa [#allocation5], 1 }
 0x598   :  { %883 = vsyncpa [#allocation5 + $0x1], 1 }

// kernel: tpu_custom_call.1
= control target key start
LH: loop header
LB: loop body
LE: loop exit
PB: predicated region body
PF: predicated region fallthrough
CT: control target
= control target key end

     0   :  { %s2019_s0 = inlined_call_operand.hbm [shape: f32[16,128], index: 0, kind: input, shape index: {}]   ;;  %s2020_s1 = inlined_call_operand.<no memory space> [shape: f32[1], index: 1, kind: input, shape index: {}]   ;;  %s2021_s2 = inlined_call_operand.hbm [shape: f32[128,128], index: 2, kind: input, shape index: {}]   ;;  %s2022_s3 = inlined_call_operand.vmem [shape: f32[1,128], index: 3, kind: input, shape index: {}]   ;;  %s2023_s4 = inlined_call_operand.hbm [shape: f32[128,128], index: 4, kind: input, shape index: {}]   ;;  %s2024_s5 = inlined_call_operand.vmem [shape: f32[1,128], index: 5, kind: input, shape index: {}]   ;;  %s2025_s6 = inlined_call_operand.hbm [shape: f32[128,128], index: 6, kind: input, shape index: {}]   ;;  %s2026_s7 = inlined_call_operand.vmem [shape: f32[1,128], index: 7, kind: input, shape index: {}]   ;;  %s2027_s8 = inlined_call_operand.hbm [shape: f32[256,128], index: 8, kind: input, shape index: {}]   ;;  %s2028_s9 = inlined_call_operand.vmem [shape: f32[1,128], index: 9, kind: input, shape index: {}]   ;;  %s2029_s10 = inlined_call_operand.hbm [shape: f32[16,128], index: 10, kind: output, shape index: {}]  }
   0x1   :  { %2034 = sst [smem:[#allocation17_spill]] %s2021_s2 }
   0x2   :  { %2035 = sst [smem:[#allocation18_spill]] %s2029_s10 }
   0x3   :  { %15 = sst [smem:[#allocation2]] %s2020_s1 }
   0x4   :  { %16 = vsyncpa [#allocation4], 0 }
   0x5   :  { %18 = vsyncpa [#allocation4 + $0x1], 0 }
   0x6   :  { %19 = vsyncpa [#allocation7], 0 }
   0x7   :  { %20 = vsyncpa [#allocation10], 0 }
   0x8   :  { %21 = vsyncpa [#allocation5], 0 }
   0x9   :  { %23 = vsyncpa [#allocation5 + $0x1], 0  ;;  %s1673_s15 = smov 0   ;;  %s1675_s16 = smov 0  }
   0xa   :  { %s1677_s17 = smov 0   ;;  %s1679_s18 = smov 0  }
   0xb LB: > { %s1604_s1 = smov [#allocation6]   ;;  %s1694_s20 = sadd.s32 4294967295, %s1602_s18   ;;  %s1602_s18 = sphi %s1679_s18, %s2058_s18   ;;  %s1598_s17 = sphi %s1677_s17, %s2057_s17   ;;  %s1594_s16 = sphi %s1675_s16, %s2056_s16   ;;  %s1590_s15 = sphi %s1673_s15, %s2055_s15  }
   0xc   : > { %s290_s19 = sshll.u32 %s1604_s1, 4  ;;  %p967_p0 = scmp.ge.s32.totalorder %s1602_s18, 1  ;;  %s1699_s19 = int_to_ptr.vmem [resolvable:$true] %s290_s19 }
   0xd   : > { %p2031_p1 = scmp.eq.s32.totalorder %s1694_s20, 0  ;;  %p275_p2 = scmp.lt.s32.totalorder %s1602_s18, 3 }
   0xe   : > { %s1605_s22 = smov [#allocation9]   ;;  %s1606_s25 = smov [#allocation8]  }
   0xf   : > { %p1701_p3 = pnand %p967_p0, %p275_p2  ;;  %s322_s23 = sshll.u32 %s1605_s22, 4  ;;  %s1714_s23 = int_to_ptr.vmem [resolvable:$true] %s322_s23 }
  0x10   : > { %s306_s26 = sshll.u32 %s1606_s25, 4  ;;  %s2038_s2 = sld [smem:[#allocation17_spill]]  ;;  %s1716_s26 = int_to_ptr.vmem [resolvable:$true] %s306_s26 }
  0x11   : > { %s2036_s21 = scalar_select %p1701_p3, 1, 0 }
  0x12   : > { %p1306_p5 = pneg %p1701_p3 }
  0x14   : > { %p1710_p6 = pnand %p1306_p5, %p2031_p1 }
  0x16   : > { %s1386_s29 = scalar_lea.hbm %s2038_s2, 2048  ;;  %p1726_p8 = pneg %p1710_p6 }
  0x17   : > { %p1387_p7 = scmp.ne.s32.totalorder %s2038_s2, %s1386_s29  ;;  %p1393_p11 = scmp.lt.u32.totalorder %s1386_s29, %s2038_s2 }
  0x19   : > { %p1389_p9 = pnand %p1726_p8, %p1387_p7 }
  0x1b   : > { %p1390_p10 = pneg %p1389_p9 }
  0x1d   : > { %p1395_p12 = pnand %p1393_p11, %p1390_p10 }
  0x1f   : > { %1398 = shalt.err (!%p1395_p12)
}
  0x20   : > { %s1399_s1 = scalar_lea.vmem %s1699_s19, 2048  ;;  %p1407_p5 = scmp.lt.s32.totalorder %s1699_s19, %s1699_s19 }
  0x21   : > { %p1400_p13 = scmp.ne.s32.totalorder %s1699_s19, %s1399_s1  ;;  %p1408_p4 = scmp.lt.s32.totalorder %s1399_s1, %s1399_s1 }
  0x23   : > { %p1402_p0 = pnand %p1400_p13, %p1726_p8  ;;  %p1409_p7 = por %p1408_p4, %p1407_p5 }
  0x25   : > { %p1403_p2 = pneg %p1402_p0 }
  0x27   : > { %p1410_p9 = pnand %p1409_p7, %p1403_p2 }
  0x29   : > { %1413 = shalt.err (!%p1410_p9)
}
  0x2a   : > { %s1607_s22 = smov 128   ;;  %s1608_s25 = smov 8  }
  0x2b   : > { %1309 = dma.hbm_to_vmem [thread:$0]  (!%p1710_p6), %s2038_s2, 2048, %s1699_s19, [#allocation7], %s1607_s22, %s1607_s22, %s1608_s25  }
  0x2c   : > { %s1414_s11 = scalar_lea.hbm %s2025_s6, 2048 }
  0x2d   : > { %p1415_p4 = scmp.ne.s32.totalorder %s2025_s6, %s1414_s11  ;;  %p1421_p12 = scmp.lt.u32.totalorder %s1414_s11, %s2025_s6 }
  0x2f   : > { %p1417_p10 = pnand %p1415_p4, %p1726_p8 }
  0x31   : > { %p1418_p11 = pneg %p1417_p10 }
  0x33   : > { %p1423_p13 = pnand %p1421_p12, %p1418_p11 }
  0x35   : > { %1426 = shalt.err (!%p1423_p13)
}
  0x36   : > { %s1427_s19 = scalar_lea.vmem %s1714_s23, 2048  ;;  %p1435_p7 = scmp.lt.s32.totalorder %s1714_s23, %s1714_s23 }
  0x37   : > { %p1428_p0 = scmp.ne.s32.totalorder %s1714_s23, %s1427_s19  ;;  %p1436_p9 = scmp.lt.s32.totalorder %s1427_s19, %s1427_s19 }
  0x39   : > { %p1430_p2 = pnand %p1428_p0, %p1726_p8  ;;  %p1437_p4 = por %p1436_p9, %p1435_p7 }
  0x3b   : > { %p1431_p5 = pneg %p1430_p2 }
  0x3d   : > { %p1438_p10 = pnand %p1437_p4, %p1431_p5 }
  0x3f   : > { %1441 = shalt.err (!%p1438_p10)
}
  0x40   : > { %1315 = dma.hbm_to_vmem [thread:$0]  (!%p1710_p6), %s2025_s6, 2048, %s1714_s23, [#allocation10], %s1607_s22, %s1607_s22, %s1608_s25  }
  0x41   : > { %s1442_s30 = scalar_lea.hbm %s2023_s4, 2048 }
  0x42   : > { %p1443_p11 = scmp.ne.s32.totalorder %s2023_s4, %s1442_s30  ;;  %p1449_p0 = scmp.lt.u32.totalorder %s1442_s30, %s2023_s4 }
  0x44   : > { %p1445_p12 = pnand %p1443_p11, %p1726_p8 }
  0x46   : > { %p1446_p13 = pneg %p1445_p12 }
  0x48   : > { %p1451_p2 = pnand %p1449_p0, %p1446_p13 }
  0x4a   : > { %1454 = shalt.err (!%p1451_p2)
}
  0x4b   : > { %s1455_s23 = scalar_lea.vmem %s1716_s26, 2048  ;;  %p1463_p4 = scmp.lt.s32.totalorder %s1716_s26, %s1716_s26 }
  0x4c   : > { %p1456_p5 = scmp.ne.s32.totalorder %s1716_s26, %s1455_s23  ;;  %p1464_p10 = scmp.lt.s32.totalorder %s1455_s23, %s1455_s23 }
  0x4e   : > { %p1458_p7 = pnand %p1456_p5, %p1726_p8  ;;  %p1465_p11 = por %p1464_p10, %p1463_p4 }
  0x50   : > { %p1459_p9 = pneg %p1458_p7 }
  0x52   : > { %p1466_p12 = pnand %p1465_p11, %p1459_p9 }
  0x54   : > { %1469 = shalt.err (!%p1466_p12)
}
  0x55   : > { %1312 = dma.hbm_to_vmem [thread:$0]  (!%p1710_p6), %s2023_s4, 2048, %s1716_s26, [#allocation7], %s1607_s22, %s1607_s22, %s1608_s25  }
  0x56   : > { %s1609_s27 = smov [#allocation11]   ;;  %s1470_s11 = scalar_lea.hbm %s2027_s8, 4096 }
  0x57   : > { %s338_s28 = sshll.u32 %s1609_s27, 4  ;;  %p1471_p13 = scmp.ne.s32.totalorder %s2027_s8, %s1470_s11  ;;  %s339_s28 = int_to_ptr.vmem [resolvable:$true] %s338_s28 }
  0x58   : > { %p1477_p5 = scmp.lt.u32.totalorder %s1470_s11, %s2027_s8 }
  0x59   : > { %p1473_p0 = pnand %p1471_p13, %p1726_p8 }
  0x5b   : > { %p1474_p2 = pneg %p1473_p0 }
  0x5d   : > { %p1479_p7 = pnand %p1477_p5, %p1474_p2 }
  0x5f   : > { %1482 = shalt.err (!%p1479_p7)
}
  0x60   : > { %s1483_s26 = scalar_lea.vmem %s339_s28, 4096  ;;  %p1491_p11 = scmp.lt.s32.totalorder %s339_s28, %s339_s28 }
  0x61   : > { %p1484_p9 = scmp.ne.s32.totalorder %s339_s28, %s1483_s26  ;;  %p1492_p12 = scmp.lt.s32.totalorder %s1483_s26, %s1483_s26 }
  0x63   : > { %p1486_p4 = pnand %p1484_p9, %p1726_p8  ;;  %p1493_p1 = por %p1492_p12, %p1491_p11 }
  0x65   : > { %p1487_p10 = pneg %p1486_p4 }
  0x67   : > { %p1494_p3 = pnand %p1493_p1, %p1487_p10 }
  0x69   : > { %1497 = shalt.err (!%p1494_p3)
}
  0x6a   : > { %1318 = dma.hbm_to_vmem [thread:$0]  (!%p1710_p6), %s2027_s8, 4096, %s339_s28, [#allocation10], %s1607_s22, %s1607_s22, %s1608_s25  }
  0x6b   : > { %s966_s24 = sadd.s32 4294967294, %s1602_s18   ;;  %s1825_s12 = sadd.s32 1, %s1602_s18  }
  0x6c   : > { %s33_s27 = ssub.s32 %s1602_s18, %s1825_s12  ;;  %s36_s29 = sadd.s32 1, %s1598_s17 }
  0x6d   : > { %p34_p1 = scmp.eq.s32.totalorder %s33_s27, 0  ;;  %p43_p3 = scmp.ne.s32.totalorder %s1598_s17, %s1594_s16 }
  0x6e   : > { %p44_p8 = scmp.eq.s32.totalorder %s1602_s18, 0  ;;  %p49_p13 = scmp.ne.s32.totalorder %s1594_s16, %s1590_s15 }
  0x6f   : > { %s1836_s30 = scalar_select %p34_p1, %s1598_s17, %s36_s29  }
  0x70   : > { %p1838_p0 = por %p44_p8, %p43_p3  ;;  %p2041_p2 = scmp.eq.s32.totalorder %s1694_s20, 0 }
  0x71   : > { %p262_p5 = scmp.eq.s32.totalorder %s1694_s20, 1  ;;  %p268_p7 = scmp.eq.s32.totalorder %s966_s24, 1 }
  0x72   : > { %p1844_p6 = por %p2041_p2, %p49_p13  ;;  %p1331_p9 = scmp.lt.s32.totalorder %s1602_s18, 2 }
  0x73   : > { %s355_s25 = sand.u32 1, %s1598_s17   ;;  %p1851_p4 = por %p262_p5, %p43_p3 }
  0x74   : > { %p1855_p10 = por %p268_p7, %p49_p13  ;;  %s973_s14 = sshll.u32 %s355_s25, 3 }
  0x75   : > { %s2043_s28 = scalar_select %p1851_p4, 1, 0 }
  0x76   : > { %s2044_s13 = scalar_select %p1855_p10, 1, 0 }
  0x77   : > { %s974_s1 = sshll.u32 %s1602_s18, 7  ;;  %s359_s10 = scalar_lea.vmem [#allocation3], %s973_s14 }
  0x78   : > { %s1863_s19 = scalar_lea.hbm %s2019_s0, %s974_s1  ;;  %s366_s24 = sshll.u32 %s359_s10, 4  ;;  %s1865_s24 = int_to_ptr.vmem [resolvable:$true] %s366_s24 }
  0x79   : > { %p1869_p11 = pnand %p1331_p9, %p1838_p0  ;;  %s356_s29 = scalar_lea.sflag [#allocation4], %s355_s25 }
  0x7a   : > { %s1498_s2 = scalar_lea.hbm %s1863_s19, 128  ;;  %s1503_s23 = scalar_lea.hbm %s2019_s0, 256 }
  0x7b   : > { %p1499_p12 = scmp.ne.s32.totalorder %s1863_s19, %s1498_s2  ;;  %p1500_p1 = pneg %p1869_p11 }
  0x7c   : > { %p1504_p13 = scmp.lt.u32.totalorder %s1863_s19, %s2019_s0  ;;  %p1505_p0 = scmp.lt.u32.totalorder %s1503_s23, %s1498_s2 }
  0x7d   : > { %p1501_p3 = pnand %p1500_p1, %p1499_p12  ;;  %p1507_p5 = scmp.lt.u32.totalorder %s1498_s2, %s1863_s19 }
  0x7e   : > { %p1506_p2 = por %p1505_p0, %p1504_p13 }
  0x7f   : > { %p1502_p8 = pneg %p1501_p3 }
  0x80   : > { %p1508_p7 = por %p1507_p5, %p1506_p2 }
  0x82   : > { %p1509_p9 = pnand %p1508_p7, %p1502_p8 }
  0x84   : > { %1512 = shalt.err (!%p1509_p9)
}
  0x85   : > { %s1513_s25 = scalar_lea.vmem %s1865_s24, 128  ;;  %s1610_s10 = smov [#allocation3]  }
  0x86   : > { %p1514_p12 = scmp.ne.s32.totalorder %s1865_s24, %s1513_s25  ;;  %s1518_s14 = sshll.u32 %s1610_s10, 4  ;;  %s1519_s14 = int_to_ptr.vmem [resolvable:$false] %s1518_s14 }
  0x87   : > { %s1520_s1 = scalar_lea.vmem %s1519_s14, 256  ;;  %p1521_p4 = scmp.lt.s32.totalorder %s1865_s24, %s1519_s14 }
  0x88   : > { %p1516_p3 = pnand %p1514_p12, %p1500_p1  ;;  %p1522_p13 = scmp.lt.s32.totalorder %s1520_s1, %s1513_s25 }
  0x8a   : > { %p1517_p10 = pneg %p1516_p3  ;;  %p1523_p0 = por %p1522_p13, %p1521_p4 }
  0x8c   : > { %p1524_p2 = pnand %p1523_p0, %p1517_p10 }
  0x8e   : > { %1527 = shalt.err (!%p1524_p2)
}
  0x8f   : > { %1322 = dma.hbm_to_vmem [thread:$0]  (!%p1869_p11), %s1863_s19, 128, %s1865_s24, %s356_s29  }
  0x90   : > { %p2046_p8 = scmp.ne.s32.totalorder %s2036_s21, 0 }
  0x91   : > { %s1901_s2 = sand.u32 (!%p2046_p8), 1, %s1594_s16  }
  0x92   : > { %375 = sbr.rel (%p2046_p8) target bundleno = 1412 (0x584), region = 60  ;;  %s976_s23 = sshll.u32 (!%p2046_p8), %s1901_s2, 3 }
  0x93   : > { %s378_s11 = scalar_lea.sflag (!%p2046_p8), [#allocation4], %s1901_s2  ;;  %s1907_s26 = scalar_lea.vmem (!%p2046_p8), [#allocation3], %s976_s23 }
  0x99   : > { %1573 = dma.done.wait (%p1844_p6), %s378_s11, 128  }
  0x9a   : > { %1575 = vsyncadd (%p1844_p6), %s378_s11, 4294967168  ;;  %p2047_p4 = scmp.eq.s32.totalorder %s1694_s20, 0 }
  0x9c   : > { %1577 = dma.done.wait (%p2047_p4), [#allocation7], 4096   ;;  %p2048_p10 = pmov %p2047_p4 }
  0x9d   : > { %p2049_p11 = pmov %p2047_p4 }
  0x9e   : > { %1579 = vsyncadd (%p2048_p10), [#allocation7], 4294963200 }
  0x9f   : > { %1581 = dma.done.wait (%p2049_p11), [#allocation10], 6144   ;;  %p2050_p1 = pmov %p2047_p4 }
  0xa0   : > { %v1611_v0 = vmov 0.0|0.0   ;;  %vm1612_vm0 = vmmov 0   ;;  %v1613_v1 = vmov 0.0   ;;  %v436_v2 = vld [vmem:[#allocation6] sm:$0xff]  ;;  %v437_v3 = vld [vmem:[#allocation6 + $0x8] sm:$0xff]  ;;  %v438_v4 = vld [vmem:[#allocation6 + $0x10] sm:$0xff] }
  0xa1   : > { %1583 = vsyncadd (%p2050_p1), [#allocation10], 4294961152  ;;  %1182 = vmatprep.subr.bf16.mxu0 %v1611_v0  ;;  %1109 = vmatprep.mubr.msk.f32.mxu0 %vm1612_vm0, %v1613_v1  ;;  %v1183_v5 = vpack.c.bf16 %v437_v3, %v436_v2  ;;  %v439_v6 = vld [vmem:[#allocation6 + $0x18] sm:$0xff]  ;;  %v440_v8 = vld [vmem:[#allocation6 + $0x20] sm:$0xff]  ;;  %s435_s21 = sld [smem:[#allocation2]]  ;;  %s988_s1 = sshll.u32 %s1694_s20, 7 }
  0xa2   : > { %1206 = vmatprep.subr.bf16.mxu1 %v1611_v0  ;;  %1144 = vmatprep.mubr.msk.f32.mxu1 %vm1612_vm0, %v1613_v1  ;;  %v1186_v7 = vpack.c.bf16 %v439_v6, %v438_v4  ;;  %v441_v9 = vld [vmem:[#allocation6 + $0x28] sm:$0xff]  ;;  %v442_v11 = vld [vmem:[#allocation6 + $0x30] sm:$0xff]  ;;  %v443_v12 = vld [vmem:[#allocation6 + $0x38] sm:$0xff]  ;;  %s433_s11 = scalar_lea.vmem [#allocation12], %s976_s23  ;;  %s2051_s19 = sld [smem:[#allocation18_spill]] }
  0xa3   : > { %1184 = vmatpush3.bf16.msra.mxu0 %v1183_v5  ;;  %v1189_v10 = vpack.c.bf16 %v441_v9, %v440_v8  ;;  %v1192_v13 = vpack.c.bf16 %v443_v12, %v442_v11  ;;  %v444_v14 = vld [vmem:[#allocation6 + $0x40] sm:$0xff]  ;;  %v445_v15 = vld [vmem:[#allocation6 + $0x48] sm:$0xff]  ;;  %v446_v17 = vld [vmem:[#allocation6 + $0x50] sm:$0xff]  ;;  %s845_s27 = scalar_lea.sflag [#allocation5], %s1901_s2  ;;  %p2052_p5 = scmp.ne.s32.totalorder %s2043_s28, 0 }
  0xa4   : > { %1185 = vmatprep.subr.bf16.mxu0 %v1611_v0  ;;  %v1195_v16 = vpack.c.bf16 %v445_v15, %v444_v14  ;;  %v447_v18 = vld [vmem:[#allocation6 + $0x58] sm:$0xff]  ;;  %v448_v20 = vld [vmem:[#allocation6 + $0x60] sm:$0xff]  ;;  %v449_v21 = vld [vmem:[#allocation6 + $0x68] sm:$0xff]  ;;  %s1614_s20 = smov [#allocation12]  }
  0xa5   : > { %v1198_v19 = vpack.c.bf16 %v447_v18, %v446_v17  ;;  %v1201_v22 = vpack.c.bf16 %v449_v21, %v448_v20  ;;  %v450_v23 = vld [vmem:[#allocation6 + $0x70] sm:$0xff]  ;;  %v451_v24 = vld [vmem:[#allocation6 + $0x78] sm:$0xff]  ;;  %v540_v33 = vld [vmem:[#allocation8] sm:$0xff]  ;;  %s1532_s23 = sshll.u32 %s1614_s20, 4  ;;  %s1533_s23 = int_to_ptr.vmem [resolvable:$false] %s1532_s23 }
  0xa6   : > { %v1204_v25 = vpack.c.bf16 %v451_v24, %v450_v23  ;;  %v1933_v26 = vld [vmem:[%s1907_s26] sm:$0xff]  ;;  %v541_v34 = vld [vmem:[#allocation8 + $0x8] sm:$0xff]  ;;  %v544_v39 = vld [vmem:[#allocation8 + $0x20] sm:$0xff]  ;;  %s858_s26 = sshll.u32 %s433_s11, 4  ;;  %s1534_s25 = scalar_lea.vmem %s1533_s23, 256  ;;  %s1977_s26 = int_to_ptr.vmem [resolvable:$true] %s858_s26 }
  0xa7   : > { %1187 = vmatpush3.bf16.msra.mxu0 %v1186_v7  ;;  %v982_v27 = vld [vmem:[%s2022_s3] ss:$0 sm:$0xff]  ;;  %v529_v29 = vstv %s435_s21  ;;  %v1207_v36 = vpack.c.bf16 %v541_v34, %v540_v33  ;;  %v543_v37 = vld [vmem:[#allocation8 + $0x18] sm:$0xff]  ;;  %v545_v40 = vld [vmem:[#allocation8 + $0x28] sm:$0xff]  ;;  %s1528_s29 = scalar_lea.vmem %s1977_s26, 128  ;;  %p1535_p12 = scmp.lt.s32.totalorder %s1977_s26, %s1533_s23 }
  0xa8   : > { %1188 = vmatprep.subr.bf16.mxu0 %v1611_v0  ;;  %v542_v35 = vld [vmem:[#allocation8 + $0x10] sm:$0xff]  ;;  %v1213_v41 = vpack.c.bf16 %v545_v40, %v544_v39  ;;  %v547_v43 = vld [vmem:[#allocation8 + $0x38] sm:$0xff]  ;;  %v548_v45 = vld [vmem:[#allocation8 + $0x40] sm:$0xff]  ;;  %s1975_s24 = scalar_lea.hbm %s2051_s19, %s988_s1  ;;  %p1529_p6 = scmp.ne.s32.totalorder %s1977_s26, %s1528_s29 }
  0xa9   : > { %1208 = vmatpush3.bf16.msra.mxu1 %v1207_v36  ;;  %v1210_v38 = vpack.c.bf16 %v543_v37, %v542_v35  ;;  %v546_v42 = vld [vmem:[#allocation8 + $0x30] sm:$0xff]  ;;  %v549_v46 = vld [vmem:[#allocation8 + $0x48] sm:$0xff]  ;;  %v551_v53 = vld [vmem:[#allocation8 + $0x58] sm:$0xff]  ;;  %p1536_p3 = scmp.lt.s32.totalorder %s1534_s25, %s1528_s29 }
  0xaa   : > { %1209 = vmatprep.subr.bf16.mxu1 %v1611_v0  ;;  %v1216_v44 = vpack.c.bf16 %v547_v43, %v546_v42  ;;  %v1219_v47 = vpack.c.bf16 %v549_v46, %v548_v45  ;;  %v550_v52 = vld [vmem:[#allocation8 + $0x50] sm:$0xff]  ;;  %v552_v55 = vld [vmem:[#allocation8 + $0x60] sm:$0xff]  ;;  %v553_v56 = vld [vmem:[#allocation8 + $0x68] sm:$0xff]  ;;  %p1530_p7 = pnand %p1529_p6, %p2052_p5 }
  0xab   : > { %1190 = vmatpush3.bf16.msra.mxu0 %v1189_v10  ;;  %v1222_v54 = vpack.c.bf16 %v551_v53, %v550_v52  ;;  %v1225_v57 = vpack.c.bf16 %v553_v56, %v552_v55  ;;  %v554_v58 = vld [vmem:[#allocation8 + $0x70] sm:$0xff]  ;;  %v555_v59 = vld [vmem:[#allocation8 + $0x78] sm:$0xff]  ;;  %v634_v61 = vld [vmem:[#allocation9] sm:$0xff]  ;;  %p1537_p13 = por %p1536_p3, %p1535_p12 }
  0xac   : > { %1191 = vmatprep.subr.bf16.mxu0 %v1611_v0  ;;  %v1228_v60 = vpack.c.bf16 %v555_v59, %v554_v58  ;;  %v635_v62 = vld [vmem:[#allocation9 + $0x8] sm:$0xff]  ;;  %v636_v63 = vld [vmem:[#allocation9 + $0x10] sm:$0xff]  ;;  %v637_v2 = vld [vmem:[#allocation9 + $0x18] sm:$0xff]  ;;  %p1531_p9 = pneg %p1530_p7 }
  0xad   : > { %1211 = vmatpush3.bf16.msra.mxu1 %v1210_v38  ;;  %v1234_v3 = vpack.c.bf16 %v637_v2, %v636_v63  ;;  %v638_v4 = vld [vmem:[#allocation9 + $0x20] sm:$0xff]  ;;  %v639_v5 = vld [vmem:[#allocation9 + $0x28] sm:$0xff]  ;;  %v640_v7 = vld [vmem:[#allocation9 + $0x30] sm:$0xff] }
  0xae   : > { %1212 = vmatprep.subr.bf16.mxu1 %v1611_v0  ;;  %v1237_v6 = vpack.c.bf16 %v639_v5, %v638_v4  ;;  %v641_v8 = vld [vmem:[#allocation9 + $0x38] sm:$0xff]  ;;  %v642_v10 = vld [vmem:[#allocation9 + $0x40] sm:$0xff]  ;;  %v643_v11 = vld [vmem:[#allocation9 + $0x48] sm:$0xff]  ;;  %p1538_p0 = pnand %p1537_p13, %p1531_p9 }
  0xaf   : > { %1193 = vmatpush3.bf16.msra.mxu0 %v1192_v13  ;;  %v1240_v9 = vpack.c.bf16 %v641_v8, %v640_v7  ;;  %v1243_v12 = vpack.c.bf16 %v643_v11, %v642_v10  ;;  %v644_v13 = vld [vmem:[#allocation9 + $0x50] sm:$0xff]  ;;  %v645_v14 = vld [vmem:[#allocation9 + $0x58] sm:$0xff]  ;;  %v647_v17 = vld [vmem:[#allocation9 + $0x68] sm:$0xff] }
  0xb0   : > { %1194 = vmatprep.subr.bf16.mxu0 %v1611_v0  ;;  %v1246_v15 = vpack.c.bf16 %v645_v14, %v644_v13  ;;  %v649_v23 = vld [vmem:[#allocation9 + $0x78] sm:$0xff]  ;;  %v734_v33 = vld [vmem:[#allocation11] sm:$0xff]  ;;  %v735_v34 = vld [vmem:[#allocation11 + $0x8] sm:$0xff] }
  0xb1   : > { %1214 = vmatpush3.bf16.msra.mxu1 %v1213_v41  ;;  %v1256_v35 = vpack.c.bf16 %v735_v34, %v734_v33  ;;  %v752_v36 = vld [vmem:[#allocation11 + $0x90] sm:$0xff]  ;;  %v753_v37 = vld [vmem:[#allocation11 + $0x98] sm:$0xff]  ;;  %v755_v42 = vld [vmem:[#allocation11 + $0xa8] sm:$0xff] }
  0xb2   : > { %1215 = vmatprep.subr.bf16.mxu1 %v1611_v0  ;;  %v1258_v38 = vpack.c.bf16 %v753_v37, %v752_v36  ;;  %v736_v39 = vld [vmem:[#allocation11 + $0x10] sm:$0xff]  ;;  %v737_v40 = vld [vmem:[#allocation11 + $0x18] sm:$0xff]  ;;  %v739_v45 = vld [vmem:[#allocation11 + $0x28] sm:$0xff] }
  0xb3   : > { %1196 = vmatpush3.bf16.msra.mxu0 %v1195_v16  ;;  %v646_v16 = vld [vmem:[#allocation9 + $0x60] sm:$0xff]  ;;  %v1260_v41 = vpack.c.bf16 %v737_v40, %v736_v39  ;;  %v760_v59 = vld [vmem:[#allocation11 + $0xd0] sm:$0xff]  ;;  %v745_v63 = vld [vmem:[#allocation11 + $0x58] sm:$0xff] }
  0xb4   : > { %1197 = vmatprep.subr.bf16.mxu0 %v1611_v0  ;;  %v1249_v18 = vpack.c.bf16 %v647_v17, %v646_v16  ;;  %v758_v53 = vld [vmem:[#allocation11 + $0xc0] sm:$0xff]  ;;  %v764_v8 = vld [vmem:[#allocation11 + $0xf0] sm:$0xff] }
  0xb5   : > { %1217 = vmatpush3.bf16.msra.mxu1 %v1216_v44  ;;  %v738_v44 = vld [vmem:[#allocation11 + $0x20] sm:$0xff]  ;;  %v748_v11 = vld [vmem:[#allocation11 + $0x70] sm:$0xff] }
  0xb6   : > { %1218 = vmatprep.subr.bf16.mxu1 %v1611_v0  ;;  %v1264_v46 = vpack.c.bf16 %v739_v45, %v738_v44  ;;  %v742_v56 = vld [vmem:[#allocation11 + $0x40] sm:$0xff]  ;;  %v984_v14 = vld [vmem:[%s2026_s7] ss:$0 sm:$0xff] }
  0xb7   : > { %1199 = vmatpush3.bf16.msra.mxu0 %v1198_v19  ;;  %v762_v2 = vld [vmem:[#allocation11 + $0xe0] sm:$0xff] }
  0xb8   : > { %1200 = vmatprep.subr.bf16.mxu0 %v1611_v0  ;;  %v746_v5 = vld [vmem:[#allocation11 + $0x60] sm:$0xff] }
  0xb9   : > { %1220 = vmatpush3.bf16.msra.mxu1 %v1219_v47  ;;  %v756_v47 = vld [vmem:[#allocation11 + $0xb0] sm:$0xff] }
  0xba   : > { %1221 = vmatprep.subr.bf16.mxu1 %v1611_v0 }
  0xbb   : > { %1202 = vmatpush3.bf16.msra.mxu0 %v1201_v22  ;;  %v648_v22 = vld [vmem:[#allocation9 + $0x70] sm:$0xff] }
  0xbc   : > { %1203 = vmatprep.subr.bf16.mxu0 %v1611_v0  ;;  %v1252_v24 = vpack.c.bf16 %v649_v23, %v648_v22 }
  0xbd   : > { %1223 = vmatpush3.bf16.msra.mxu1 %v1222_v54  ;;  %v759_v54 = vld [vmem:[#allocation11 + $0xc8] sm:$0xff] }
  0xbe   : > { %1224 = vmatprep.subr.bf16.mxu1 %v1611_v0  ;;  %v1270_v55 = vpack.c.bf16 %v759_v54, %v758_v53 }
  0xbf   : > { %1205 = vmatpush3.bf16.msra.mxu0 %v1204_v25  ;;  %v983_v25 = vld [vmem:[%s2024_s5] ss:$0 sm:$0xff] }
  0xc0   : > { %1230 = vmatprep.subr.bf16.mxu0 %v1611_v0 }
  0xc1   : > { %1226 = vmatpush3.bf16.msra.mxu1 %v1225_v57  ;;  %v743_v57 = vld [vmem:[#allocation11 + $0x48] sm:$0xff] }
  0xc2   : > { %1110 = vmatmul.mubr.f32.vlgmr.msra.gmra.mrb[0].mxu0 %v1933_v26  ;;  %1227 = vmatprep.subr.bf16.mxu1 %v1611_v0  ;;  %v1272_v58 = vpack.c.bf16 %v743_v57, %v742_v56 }
  0xc3   : > { %1179 = vmatprep.mubr.msk.f32.mxu0 %vm1612_vm0, %v1613_v1  ;;  %v1231_v1 = vpack.c.bf16 %v635_v62, %v634_v61  ;;  %v744_v62 = vld [vmem:[#allocation11 + $0x50] sm:$0xff] }
  0xc5   : > { %1229 = vmatpush3.bf16.msra.mxu1 %v1228_v60  ;;  %1232 = vmatpush3.bf16.msra.mxu0 %v1231_v1  ;;  %v761_v60 = vld [vmem:[#allocation11 + $0xd8] sm:$0xff]  ;;  %v1276_v1 = vpack.c.bf16 %v745_v63, %v744_v62 }
  0xc6   : > { %1233 = vmatprep.subr.bf16.mxu0 %v1611_v0  ;;  %v1274_v61 = vpack.c.bf16 %v761_v60, %v760_v59 }
  0xc9   : > { %1235 = vmatpush3.bf16.msra.mxu0 %v1234_v3  ;;  %v763_v3 = vld [vmem:[#allocation11 + $0xe8] sm:$0xff] }
  0xca   : > { %1236 = vmatprep.subr.bf16.mxu0 %v1611_v0  ;;  %v1278_v4 = vpack.c.bf16 %v763_v3, %v762_v2 }
  0xcd   : > { %1238 = vmatpush3.bf16.msra.mxu0 %v1237_v6  ;;  %v747_v6 = vld [vmem:[#allocation11 + $0x68] sm:$0xff] }
  0xce   : > { %1239 = vmatprep.subr.bf16.mxu0 %v1611_v0  ;;  %v1280_v7 = vpack.c.bf16 %v747_v6, %v746_v5 }
  0xd1   : > { %1241 = vmatpush3.bf16.msra.mxu0 %v1240_v9  ;;  %v765_v9 = vld [vmem:[#allocation11 + $0xf8] sm:$0xff] }
  0xd2   : > { %1242 = vmatprep.subr.bf16.mxu0 %v1611_v0  ;;  %v1282_v10 = vpack.c.bf16 %v765_v9, %v764_v8 }
  0xd5   : > { %1244 = vmatpush3.bf16.msra.mxu0 %v1243_v12  ;;  %v749_v12 = vld [vmem:[#allocation11 + $0x78] sm:$0xff] }
  0xd6   : > { %1245 = vmatprep.subr.bf16.mxu0 %v1611_v0  ;;  %v1284_v13 = vpack.c.bf16 %v749_v12, %v748_v11 }
  0xd9   : > { %1247 = vmatpush3.bf16.msra.mxu0 %v1246_v15 }
  0xda   : > { %1248 = vmatprep.subr.bf16.mxu0 %v1611_v0 }
  0xdd   : > { %1250 = vmatpush3.bf16.msra.mxu0 %v1249_v18 }
  0xde   : > { %1251 = vmatprep.subr.bf16.mxu0 %v1611_v0  ;;  %v750_v0 = vld [vmem:[#allocation11 + $0x80] sm:$0xff] }
  0xe1   : > { %1253 = vmatpush3.bf16.msra.mxu0 %v1252_v24  ;;  %v986_v24 = vld [vmem:[%s2028_s9] ss:$0 sm:$0xff] }
 0x195   : > { %v525_v28 = vpop.f32.mrb[0].mxu0 }
 0x196   : > { %v526_v30 = vadd.f32 %v982_v27, %v525_v28  ;;  %v1111_v31 = vpop.f32.mrb[1].mxu0 }
 0x197   : > { %v751_v31 = vld [vmem:[#allocation11 + $0x88] sm:$0xff] }
 0x198   : > { %v530_v32 = vmul.f32 %v529_v29, %v526_v30 }
 0x19a   : > { %531 = vmax.xlane.f32.xlu0 %v530_v32 }
 0x227   : > { %v532_v48 = vpop.xlane.xlu0 %531 }
 0x228   : > { %v533_v49 = vsub.f32 %v530_v32, %v532_v48  ;;  %v1254_v32 = vpack.c.bf16 %v751_v31, %v750_v0  ;;  %v757_v48 = vld [vmem:[#allocation11 + $0xb8] sm:$0xff] }
 0x22a   : > { %v534_v50 = vmul.f32 1.442695, %v533_v49  ;;  %1255 = vmatprep.subr.bf16.mxu1 %v1254_v32  ;;  %v1266_v49 = vpack.c.bf16 %v757_v48, %v756_v47 }
 0x22c   : > { %1378 = vpow2.f32 %v534_v50  ;;  %v740_v50 = vld [vmem:[#allocation11 + $0x30] sm:$0xff] }
 0x236   : > { %v1379_v51 = vpop.eup %1378 }
 0x237   : > { %536 = vadd.xlane.f32.xlu0 %v1379_v51 }
 0x2c4   : > { %v537_v19 = vpop.xlane.xlu0 %536 }
 0x2c5   : > { %1380 = vrcp.f32 %v537_v19 }
 0x2cf   : > { %v1381_v20 = vpop.eup %1380 }
 0x2d0   : > { %v539_v21 = vmul.f32 %v1381_v20, %v1379_v51  ;;  %v741_v51 = vld [vmem:[#allocation11 + $0x38] sm:$0xff] }
 0x2d1   : > { %v1268_v52 = vpack.c.bf16 %v741_v51, %v740_v50 }
 0x2d2   : > { %1145 = vmatmul.mubr.f32.vlgmr.msra.gmra.mrb[0].mxu1 %v539_v21 }
 0x2d3   : > { %1257 = vmatpush3.bf16.msra.mxu1 %v1256_v35 }
 0x2d4   : > { %1259 = vmatprep.subr.bf16.mxu1 %v1258_v38 }
 0x2d7   : > { %1261 = vmatpush3.bf16.msra.mxu1 %v1260_v41 }
 0x3a5   : > { %v629_v27 = vpop.f32.mrb[0].mxu1 }
 0x3a6   : > { %v630_v28 = vadd.f32 %v983_v25, %v629_v27  ;;  %v1146_v29 = vpop.f32.mrb[1].mxu1 }
 0x3a8   : > { %v1959_v30 = vadd.f32 %v630_v28, %v1933_v26  ;;  %v754_v26 = vld [vmem:[#allocation11 + $0xa0] sm:$0xff] }
 0x3a9   : > { %v1262_v43 = vpack.c.bf16 %v755_v42, %v754_v26 }
 0x3aa   : > { %1180 = vmatmul.mubr.f32.vlgmr.msra.gmra.mrb[2].mxu0 %v1959_v30 }
 0x3ab   : > { %1263 = vmatprep.subr.bf16.mxu1 %v1262_v43 }
 0x3ac   : > { %1265 = vmatpush3.bf16.msra.mxu1 %v1264_v46 }
 0x3ad   : > { %1267 = vmatprep.subr.bf16.mxu1 %v1266_v49 }
 0x3b0   : > { %1269 = vmatpush3.bf16.msra.mxu1 %v1268_v52 }
 0x3b1   : > { %1271 = vmatprep.subr.bf16.mxu1 %v1270_v55 }
 0x3b4   : > { %1273 = vmatpush3.bf16.msra.mxu1 %v1272_v58 }
 0x3b5   : > { %1275 = vmatprep.subr.bf16.mxu1 %v1274_v61 }
 0x3b8   : > { %1277 = vmatpush3.bf16.msra.mxu1 %v1276_v1 }
 0x3b9   : > { %1279 = vmatprep.subr.bf16.mxu1 %v1278_v4 }
 0x3bc   : > { %1281 = vmatpush3.bf16.msra.mxu1 %v1280_v7 }
 0x3bd   : > { %1283 = vmatprep.subr.bf16.mxu1 %v1282_v10 }
 0x3c0   : > { %1285 = vmatpush3.bf16.msra.mxu1 %v1284_v13 }
 0x47d   : > { %v723_v15 = vpop.f32.mrb[2].mxu0 }
 0x47e   : > { %v724_v16 = vadd.f32 %v984_v14, %v723_v15  ;;  %v1181_v17 = vpop.f32.mrb[3].mxu0 }
 0x480   : > { %v985_v18 = vmul.f32 -1.442695, %v724_v16 }
 0x482   : > { %1382 = vpow2.f32 %v985_v18 }
 0x48c   : > { %v1383_v19 = vpop.eup %1382 }
 0x48d   : > { %v730_v20 = vadd.f32 1.0, %v1383_v19 }
 0x48f   : > { %1384 = vrcp.f32 %v730_v20 }
 0x499   : > { %v1385_v21 = vpop.eup %1384 }
 0x49a   : > { %v733_v22 = vmul.f32 %v1385_v21, %v724_v16 }
 0x49c   : > { %837 = vmatprep.mubr.f32.mxu1 %v733_v22 }
 0x49d   : > { %838 = vmatmul.mubr.f32.vlgmr.msra.gmra.mrb[2].mxu1 %v1959_v30 }
 0x570   : > { %v1074_v23 = vpop.f32.mrb[2].mxu1 }
 0x571   : > { %v1075_v25 = vpop.f32.mrb[3].mxu1 }
 0x572   : > { %v1076_v27 = vadd.f32 %v1075_v25, %v1074_v23 }
 0x574   : > { %v840_v28 = vadd.f32 %v1076_v27, %v986_v24 }
 0x576   : > { %843 = vst [vmem:[%s433_s11] sm:$0xff] %v840_v28 }
 0x577   : > { %1541 = shalt.err (!%p1538_p0)
}
 0x578   : > { %s1542_s2 = scalar_lea.hbm %s1975_s24, 128  ;;  %s1546_s1 = scalar_lea.hbm %s2051_s19, 256 }
 0x579   : > { %p1543_p2 = scmp.ne.s32.totalorder %s1975_s24, %s1542_s2  ;;  %p1547_p10 = scmp.lt.u32.totalorder %s1975_s24, %s2051_s19 }
 0x57a   : > { %p1548_p11 = scmp.lt.u32.totalorder %s1546_s1, %s1542_s2  ;;  %p1550_p6 = scmp.lt.u32.totalorder %s1542_s2, %s1975_s24 }
 0x57b   : > { %p1544_p8 = pnand %p1543_p2, %p2052_p5 }
 0x57c   : > { %p1549_p1 = por %p1548_p11, %p1547_p10 }
 0x57d   : > { %p1545_p4 = pneg %p1544_p8 }
 0x57e   : > { %p1551_p7 = por %p1550_p6, %p1549_p1 }
 0x580   : > { %p1552_p9 = pnand %p1551_p7, %p1545_p4 }
 0x582   : > { %1555 = shalt.err (!%p1552_p9)
}
 0x583   : > { %1304 = dma.vmem_to_hbm [thread:$0]  (%p2052_p5), %s1977_s26, 128, %s1975_s24, %s845_s27  }
 0x584 PF: > { %s870_s22 = sand.u32 1, %s1590_s15   ;;  %p2053_p12 = scmp.ne.s32.totalorder %s2044_s13, 0 }
 0x585   : > { %p2054_p3 = scmp.ge.s32.totalorder %s1602_s18, 2  ;;  %s871_s29 = scalar_lea.sflag [#allocation5], %s870_s22 }
 0x587   : > { %p1324_p13 = pnand %p2054_p3, %p2053_p12 }
 0x589   : > { %1585 = dma.done.wait (!%p1324_p13), %s871_s29, 128  }
 0x58a   : > { %1587 = vsyncadd (!%p1324_p13), %s871_s29, 4294967168  ;;  %p26_p0 = scmp.ge.s32.totalorder %s1825_s12, 4   ;;  %s2055_s15 = smov %s1594_s16 }
 0x58b   : > { %s2056_s16 = smov %s1598_s17  ;;  %s2057_s17 = smov %s1836_s30 }
 0x58c   : > { %s2058_s18 = smov %s1825_s12  ;;  %28 = sbr.rel (!%p26_p0) target bundleno = 11 (0xb), region = 121 }
 0x593   :  { %876 = vsyncpa [#allocation4], 1 }
 0x594   :  { %878 = vsyncpa [#allocation4 + $0x1], 1 }
 0x595   :  { %879 = vsyncpa [#allocation7], 1 }
 0x596   :  { %880 = vsyncpa [#allocation10], 1 }
 0x597   :  { %881 = vsyncpa [#allocation5], 1 }
 0x598   :  { %883 = vsyncpa [#allocation5 + $0x1], 1 }

</bundles_post_ra>
